<compile_context>
chip_gen: v7x
topology: tpu7x:2x2x1
jax: 0.10.0
libtpu: 0.0.40
codegen_flags: <defaults>
</compile_context>

<pallas_src>
import functools
import math

import jax
import jax.numpy as jnp
from jax.experimental import pallas as pl
from jax.experimental.pallas import tpu as pltpu


def mlp_kernel(x_ref, halo_ref, mask_ref, w1_ref, b1_ref, wd_ref, bd_ref,
               w2_ref, b2_ref, o_ref, *, W, matmul_dtype):
    # x_ref    : (1, Cin, S)      one row-tile, channel-major, S = TH*W flattened spatial
    # halo_ref : (1, 1, Cin, 2W)  input row just above | just below this tile (zeros at borders)
    # mask_ref : (2, S + 2W)      0/1 column masks (left-edge, right-edge) in band layout
    # w1_ref   : (Ch, Cin)   b1_ref: (Ch, 1)
    # wd_ref   : (Ch, 9)     depthwise taps, column k = ky*3+kx        bd_ref: (Ch, 1)
    # w2_ref   : (Cout, Ch)  b2_ref: (Cout, 1)
    # o_ref    : (1, Cout, S)
    _, Cin, S = x_ref.shape
    Ch = w1_ref.shape[0]
    Cout = w2_ref.shape[0]
    band = S + 2 * W                       # [above row | tile rows | below row], row-major

    t = pl.program_id(1)
    nt = pl.num_programs(1)
    md = matmul_dtype

    w1 = w1_ref[...].astype(md)
    b1 = b1_ref[...].astype(jnp.float32)   # (Ch, 1)

    # ---- conv1 (1x1) on the tile: (Ch,Cin) @ (Cin,S) on the MXU, f32 accumulation ----
    h_mid = jnp.dot(w1, x_ref[0].astype(md),
                    preferred_element_type=jnp.float32) + b1            # (Ch, S)

    # ---- conv1 on the 2 halo rows; zero them where they fall outside the image so the
    #      depthwise conv sees true zero padding (conv1(0) + b1 != 0).  Small (Ch,2W) select.
    h_halo = jnp.dot(w1, halo_ref[0, 0].astype(md),
                     preferred_element_type=jnp.float32) + b1           # (Ch, 2W)
    col2 = jax.lax.broadcasted_iota(jnp.int32, (1, 2 * W), 1)
    keep = jnp.logical_and(jnp.logical_or(col2 >= W, t > 0),            # above row valid if not top tile
                           jnp.logical_or(col2 < W, t < nt - 1))        # below row valid if not bottom tile
    h_halo = jnp.where(keep, h_halo, 0.0)

    # ---- extended hidden band with one zero guard column at each end ----
    #      [0 | above row | tile rows | below row | 0]   length band + 2
    zcol = jnp.zeros((Ch, 1), jnp.float32)
    h_ext = jnp.concatenate([zcol, h_halo[:, :W], h_mid, h_halo[:, W:], zcol], axis=1)

    # ---- depthwise 3x3, padding=1 ----
    # dx-shifted views = static lane slices of h_ext times a precomputed 0/1 column mask;
    # dy-shifts = further static slices at offsets 0 / W / 2W of the band.
    g = (h_ext[:, 0:band] * mask_ref[0:1, :],       # value at x-1 (0 at the left image edge)
         h_ext[:, 1:band + 1],                      # value at x
         h_ext[:, 2:band + 2] * mask_ref[1:2, :])   # value at x+1 (0 at the right image edge)

    wd = wd_ref[...]                                # (Ch, 9) — loaded once
    acc = None
    for dy in range(3):                             # fully unrolled: 9 VPU FMAs on (Ch, S)
        for dx in range(3):
            k = 3 * dy + dx
            term = g[dx][:, dy * W:dy * W + S] * wd[:, k:k + 1]
            acc = term if acc is None else acc + term
    acc = jnp.maximum(acc + bd_ref[...].astype(jnp.float32), 0.0)       # bias + ReLU

    # ---- conv2 (1x1): (Cout,Ch) @ (Ch,S); the store is lane-dense (S % 128 == 0 or full image)
    out = jnp.dot(w2_ref[...].astype(md), acc.astype(md),
                  preferred_element_type=jnp.float32) + b2_ref[...].astype(jnp.float32)
    o_ref[...] = out.reshape(1, Cout, S).astype(o_ref.dtype)


def _vmem_capacity_bytes():
    try:
        return int(pltpu.get_tpu_info().vmem_capacity_bytes)
    except Exception:
        return 64 * 1024 * 1024   # conservative (v7x-sized) fallback


def _pick_tile_rows(B, H, W, Cin, Ch, Cout):
    """Largest row-tile TH (divisor of H; lane-dense: TH*W % 128 == 0 or TH == H) whose
    working set fits a generation-aware VMEM budget.  A row split is only forced when
    B == 1 (otherwise the batch grid axis already feeds both v7x TensorCores)."""
    cap = _vmem_capacity_bytes()
    budget = (2 * cap) // 5                                   # ~40% of physical VMEM
    # per extended row (f32): ~8 live (Ch, W) copies + double-buffered x / out blocks
    per_row = 4 * W * (8 * Ch + 2 * 2 * Cin + 2 * 2 * Cout)
    divisors = [d for d in range(1, H + 1) if H % d == 0]
    ok = [d for d in divisors if (d * W) % 128 == 0 or d == H] or [H]
    fitting = [d for d in ok if (d + 2) * per_row <= budget] or [min(ok)]
    # TODO(synk): for huge W*Ch nothing lane-dense may fit the budget; column tiling needed.
    if B == 1:
        split = [d for d in fitting if d < H]
        if split:
            return max(split)
    return max(fitting)


def mlp_forward(x_nchw, params, *, tile_rows=None, matmul_dtype=jnp.bfloat16):
    """NCHW in, NCHW out — semantics match the PyTorch Mlp.forward.

    The two 1x1 convs run with bf16 MXU inputs and f32 accumulation by default
    (pass matmul_dtype=jnp.float32 for bit-level f32 matmuls)."""
    w1, b1, wd, bd, w2, b2 = params
    B, Cin, H, W = x_nchw.shape
    Ch = w1.shape[0]
    Cout = w2.shape[0]

    TH = tile_rows if tile_rows is not None else _pick_tile_rows(B, H, W, Cin, Ch, Cout)
    assert H % TH == 0, "tile_rows must divide H"
    nT = H // TH
    S = TH * W
    band = S + 2 * W

    x_f = x_nchw.reshape(B, Cin, H * W)        # free reshape: channel-major, spatial on lanes

    # Halo rows: the input row just above / below each row-tile (zeros at the image borders).
    zrow = jnp.zeros((B, Cin, 1, W), x_nchw.dtype)
    above = jnp.concatenate([zrow, x_nchw[:, :, TH - 1:H - 1:TH, :]], axis=2)    # (B,Cin,nT,W)
    below = jnp.concatenate([x_nchw[:, :, TH:H:TH, :], zrow], axis=2)            # (B,Cin,nT,W)
    halo = jnp.transpose(jnp.concatenate([above, below], axis=3), (0, 2, 1, 3))  # (B,nT,Cin,2W)

    # 0/1 column masks for the depthwise left/right zero-padding (row-major band layout).
    col = jnp.arange(band, dtype=jnp.int32) % W
    colmask = jnp.stack([col != 0, col != W - 1]).astype(jnp.float32)            # (2, band)

    flops = 2 * B * H * W * Ch * (Cin + 9 + Cout)
    bytes_accessed = 4 * int(x_f.size + halo.size + B * Cout * H * W + colmask.size
                             + w1.size + b1.size + wd.size + bd.size + w2.size + b2.size)

    cap = _vmem_capacity_bytes()
    vmem_limit = int(min(cap * 3 // 4, 96 * 1024 * 1024))    # ~48 MiB on v7x, 96 MiB on 128 MiB parts

    kernel = functools.partial(mlp_kernel, W=W, matmul_dtype=matmul_dtype)

    out_f = pl.pallas_call(
        kernel,
        out_shape=jax.ShapeDtypeStruct((B, Cout, H * W), x_nchw.dtype),
        grid=(B, nT),
        in_specs=[
            pl.BlockSpec((1, Cin, S), lambda b, t: (b, 0, t)),
            pl.BlockSpec((1, 1, Cin, 2 * W), lambda b, t: (b, t, 0, 0)),
            pl.BlockSpec((2, band), lambda b, t: (0, 0)),
            pl.BlockSpec((Ch, Cin), lambda b, t: (0, 0)),
            pl.BlockSpec((Ch, 1), lambda b, t: (0, 0)),
            pl.BlockSpec((Ch, 9), lambda b, t: (0, 0)),
            pl.BlockSpec((Ch, 1), lambda b, t: (0, 0)),
            pl.BlockSpec((Cout, Ch), lambda b, t: (0, 0)),
            pl.BlockSpec((Cout, 1), lambda b, t: (0, 0)),
        ],
        out_specs=pl.BlockSpec((1, Cout, S), lambda b, t: (b, 0, t)),
        compiler_params=pltpu.CompilerParams(
            dimension_semantics=("parallel", "parallel"),
            vmem_limit_bytes=vmem_limit),
        cost_estimate=pl.CostEstimate(flops=flops, transcendentals=0,
                                      bytes_accessed=bytes_accessed),
    )(x_f, halo, colmask, w1, b1, wd, bd, w2, b2)

    return out_f.reshape(B, Cout, H, W)


def init_params(key, network_depth, in_features, hidden_features=None, out_features=None):
    """Deterministic re-implementation of Mlp._init_weights (trunc normal, zero bias),
    emitted directly in the kernel's (out, in)-major layouts."""
    hidden_features = hidden_features or in_features
    out_features = out_features or in_features
    gain = (8.0 * network_depth) ** (-1.0 / 4.0)

    def trunc(k, shape, fan_in, fan_out):
        std = gain * math.sqrt(2.0 / float(fan_in + fan_out))
        return std * jax.random.truncated_normal(k, -2.0, 2.0, shape, jnp.float32)

    k1, k2, k3 = jax.random.split(key, 3)
    # conv1 (1x1): torch weight (Ch, Cin, 1, 1) -> (Ch, Cin); fan_in=Cin, fan_out=Ch
    w1 = trunc(k1, (hidden_features, in_features), in_features, hidden_features)
    b1 = jnp.zeros((hidden_features, 1), jnp.float32)
    # depthwise (3x3, groups=Ch): torch weight (Ch, 1, 3, 3) -> (Ch, ky*3+kx); fan_in=9, fan_out=9*Ch
    wd = trunc(k2, (hidden_features, 9), 9, hidden_features * 9)
    bd = jnp.zeros((hidden_features, 1), jnp.float32)
    # conv2 (1x1): torch weight (Cout, Ch, 1, 1) -> (Cout, Ch); fan_in=Ch, fan_out=Cout
    w2 = trunc(k3, (out_features, hidden_features), hidden_features, out_features)
    b2 = jnp.zeros((out_features, 1), jnp.float32)
    return (w1, b1, wd, bd, w2, b2)


def mlp_reference(x_nchw, params, *, matmul_dtype=jnp.bfloat16):
    """Pure-JAX reference (no Pallas) with the same bf16-operand / f32-accumulate math."""
    w1, b1, wd, bd, w2, b2 = params
    B, Cin, H, W = x_nchw.shape
    Ch = w1.shape[0]
    Cout = w2.shape[0]
    f32 = jnp.float32
    md = matmul_dtype

    x = x_nchw.astype(md).astype(f32)
    h = jnp.einsum("oc,bchw->bohw", w1.astype(md).astype(f32), x) + b1.reshape(1, Ch, 1, 1)
    hp = jnp.pad(h, ((0, 0), (0, 0), (1, 1), (1, 1)))
    acc = jnp.zeros_like(h)
    for ky in range(3):
        for kx in range(3):
            acc = acc + hp[:, :, ky:ky + H, kx:kx + W] * wd[:, 3 * ky + kx].reshape(1, Ch, 1, 1)
    acc = jnp.maximum(acc + bd.reshape(1, Ch, 1, 1), 0.0)
    out = (jnp.einsum("oc,bchw->bohw", w2.astype(md).astype(f32), acc.astype(md).astype(f32))
           + b2.reshape(1, Cout, 1, 1))
    return out


if __name__ == "__main__":
    key = jax.random.PRNGKey(0)
    k_x, k_p = jax.random.split(key)

    B, Cin, H, W = 2, 4, 16, 16
    hidden, Cout = 32, 4
    network_depth = 4

    x = jax.random.normal(k_x, (B, Cin, H, W), jnp.float32)
    params = init_params(k_p, network_depth, Cin, hidden, Cout)

    # Default path: whole image per grid step (B=2 already feeds both TensorCores).
    out = mlp_forward(x, params)
    out = jax.block_until_ready(out)
    assert out.shape == (B, Cout, H, W)

    # Forced 2-way row tiling: exercises the halo / border-masking path.
    out_tiled = mlp_forward(x, params, tile_rows=8)
    out_tiled = jax.block_until_ready(out_tiled)

    ref = mlp_reference(x, params)   # same bf16-operand, f32-accumulate math
    assert jnp.allclose(out, ref, atol=1e-3, rtol=1e-3), "Pallas result mismatch vs reference"
    assert jnp.allclose(out_tiled, ref, atol=1e-3, rtol=1e-3), "row-tiled result mismatch vs reference"

    print("KERNEL_OK")
</pallas_src>

<mosaic_0001>
module attributes {stable_mosaic.version = 11 : i64} {
  func.func @mlp_kernel(%arg0: i32, %arg1: i32, %arg2: memref<1x4x256xf32, #tpu.memory_space<vmem>>, %arg3: memref<1x1x4x32xf32, #tpu.memory_space<vmem>>, %arg4: memref<2x288xf32, #tpu.memory_space<vmem>>, %arg5: memref<32x4xf32, #tpu.memory_space<vmem>>, %arg6: memref<32x1xf32, #tpu.memory_space<vmem>>, %arg7: memref<32x9xf32, #tpu.memory_space<vmem>>, %arg8: memref<32x1xf32, #tpu.memory_space<vmem>>, %arg9: memref<4x32xf32, #tpu.memory_space<vmem>>, %arg10: memref<4x1xf32, #tpu.memory_space<vmem>>, %arg11: memref<1x4x256xf32, #tpu.memory_space<vmem>>) attributes {dimension_semantics = [#tpu.dimension_semantics<parallel>, #tpu.dimension_semantics<parallel>], iteration_bounds = array<i64: 2, 1>, scalar_prefetch = 0 : i64, scratch_operands = 0 : i64, tpu.core_type = #tpu.core_type<tc>, window_params = [{transform_indices = @transform_0, window_bounds = array<i64: 1, 4, 256>}, {transform_indices = @transform_1, window_bounds = array<i64: 1, 1, 4, 32>}, {pipeline_mode = #tpu.pipeline_mode<synchronous>, transform_indices = @transform_2, window_bounds = array<i64: 2, 288>}, {pipeline_mode = #tpu.pipeline_mode<synchronous>, transform_indices = @transform_3, window_bounds = array<i64: 32, 4>}, {pipeline_mode = #tpu.pipeline_mode<synchronous>, transform_indices = @transform_4, window_bounds = array<i64: 32, 1>}, {pipeline_mode = #tpu.pipeline_mode<synchronous>, transform_indices = @transform_5, window_bounds = array<i64: 32, 9>}, {pipeline_mode = #tpu.pipeline_mode<synchronous>, transform_indices = @transform_6, window_bounds = array<i64: 32, 1>}, {pipeline_mode = #tpu.pipeline_mode<synchronous>, transform_indices = @transform_7, window_bounds = array<i64: 4, 32>}, {pipeline_mode = #tpu.pipeline_mode<synchronous>, transform_indices = @transform_8, window_bounds = array<i64: 4, 1>}, {transform_indices = @transform_9, window_bounds = array<i64: 1, 4, 256>}]} {
    %c0 = arith.constant 0 : index
    %c0_0 = arith.constant 0 : index
    %0 = vector.load %arg5[%c0, %c0_0] : memref<32x4xf32, #tpu.memory_space<vmem>>, vector<32x4xf32>
    %1 = arith.truncf %0 : vector<32x4xf32> to vector<32x4xbf16>
    %c0_1 = arith.constant 0 : index
    %c0_2 = arith.constant 0 : index
    %2 = vector.load %arg6[%c0_1, %c0_2] : memref<32x1xf32, #tpu.memory_space<vmem>>, vector<32x1xf32>
    %c0_3 = arith.constant 0 : index
    %c0_4 = arith.constant 0 : index
    %c0_5 = arith.constant 0 : index
    %3 = vector.load %arg2[%c0_3, %c0_4, %c0_5] : memref<1x4x256xf32, #tpu.memory_space<vmem>>, vector<1x4x256xf32>
    %4 = vector.shape_cast %3 : vector<1x4x256xf32> to vector<4x256xf32>
    %5 = arith.truncf %4 : vector<4x256xf32> to vector<4x256xbf16>
    %cst = arith.constant dense<0.000000e+00> : vector<32x256xf32>
    %6 = tpu.matmul %1, %5, %cst {dimension_numbers = #tpu.dot_dimension_numbers<[1], [0], [0], [1], [0, 0, 1, 1], [], []>} : vector<32x4xbf16>, vector<4x256xbf16>, vector<32x256xf32> -> vector<32x256xf32>
    %7 = vector.broadcast %2 : vector<32x1xf32> to vector<32x256xf32>
    %8 = arith.addf %6, %7 : vector<32x256xf32>
    %c0_6 = arith.constant 0 : index
    %c0_7 = arith.constant 0 : index
    %c0_8 = arith.constant 0 : index
    %c0_9 = arith.constant 0 : index
    %9 = vector.load %arg3[%c0_6, %c0_7, %c0_8, %c0_9] : memref<1x1x4x32xf32, #tpu.memory_space<vmem>>, vector<1x1x4x32xf32>
    %10 = vector.shape_cast %9 : vector<1x1x4x32xf32> to vector<4x32xf32>
    %11 = arith.truncf %10 : vector<4x32xf32> to vector<4x32xbf16>
    %cst_10 = arith.constant dense<0.000000e+00> : vector<32x32xf32>
    %12 = tpu.matmul %1, %11, %cst_10 {dimension_numbers = #tpu.dot_dimension_numbers<[1], [0], [0], [1], [0, 0, 1, 1], [], []>} : vector<32x4xbf16>, vector<4x32xbf16>, vector<32x32xf32> -> vector<32x32xf32>
    %13 = vector.broadcast %2 : vector<32x1xf32> to vector<32x32xf32>
    %14 = arith.addf %12, %13 : vector<32x32xf32>
    %15 = tpu.iota {dimensions = array<i32: 1>} : vector<1x32xi32>
    %c16_i32 = arith.constant 16 : i32
    %16 = vector.broadcast %c16_i32 : i32 to vector<1x32xi32>
    %17 = arith.cmpi sge, %15, %16 : vector<1x32xi32>
    %c0_i32 = arith.constant 0 : i32
    %18 = arith.cmpi sgt, %arg1, %c0_i32 : i32
    %19 = vector.broadcast %18 : i1 to vector<1x32xi1>
    %20 = arith.ori %17, %19 : vector<1x32xi1>
    %c16_i32_11 = arith.constant 16 : i32
    %21 = vector.broadcast %c16_i32_11 : i32 to vector<1x32xi32>
    %22 = arith.cmpi slt, %15, %21 : vector<1x32xi32>
    %c0_i32_12 = arith.constant 0 : i32
    %23 = arith.cmpi slt, %arg1, %c0_i32_12 : i32
    %24 = vector.broadcast %23 : i1 to vector<1x32xi1>
    %25 = arith.ori %22, %24 : vector<1x32xi1>
    %26 = arith.andi %20, %25 : vector<1x32xi1>
    %cst_13 = arith.constant 0.000000e+00 : f32
    %27 = vector.shape_cast %26 : vector<1x32xi1> to vector<1x32xi1>
    %28 = vector.broadcast %27 : vector<1x32xi1> to vector<32x32xi1>
    %29 = vector.broadcast %cst_13 : f32 to vector<32x32xf32>
    %30 = arith.select %28, %14, %29 : vector<32x32xi1>, vector<32x32xf32>
    %cst_14 = arith.constant 0.000000e+00 : f32
    %31 = vector.broadcast %cst_14 : f32 to vector<32x1xf32>
    %32 = vector.extract_strided_slice %30 {offsets = [0, 0], sizes = [32, 16], strides = [1, 1]} : vector<32x32xf32> to vector<32x16xf32>
    %33 = vector.extract_strided_slice %30 {offsets = [0, 16], sizes = [32, 16], strides = [1, 1]} : vector<32x32xf32> to vector<32x16xf32>
    %34 = tpu.concatenate %31, %32, %8, %33, %31 in 1 : vector<32x1xf32>, vector<32x16xf32>, vector<32x256xf32>, vector<32x16xf32>, vector<32x1xf32> -> vector<32x290xf32>
    %35 = vector.extract_strided_slice %34 {offsets = [0, 0], sizes = [32, 288], strides = [1, 1]} : vector<32x290xf32> to vector<32x288xf32>
    %c0_15 = arith.constant 0 : index
    %c0_16 = arith.constant 0 : index
    %36 = vector.load %arg4[%c0_15, %c0_16] : memref<2x288xf32, #tpu.memory_space<vmem>>, vector<1x288xf32>
    %37 = vector.broadcast %36 : vector<1x288xf32> to vector<32x288xf32>
    %38 = arith.mulf %35, %37 : vector<32x288xf32>
    %39 = vector.extract_strided_slice %34 {offsets = [0, 1], sizes = [32, 288], strides = [1, 1]} : vector<32x290xf32> to vector<32x288xf32>
    %40 = vector.extract_strided_slice %34 {offsets = [0, 2], sizes = [32, 288], strides = [1, 1]} : vector<32x290xf32> to vector<32x288xf32>
    %c1 = arith.constant 1 : index
    %c0_17 = arith.constant 0 : index
    %41 = vector.load %arg4[%c1, %c0_17] : memref<2x288xf32, #tpu.memory_space<vmem>>, vector<1x288xf32>
    %42 = vector.broadcast %41 : vector<1x288xf32> to vector<32x288xf32>
    %43 = arith.mulf %40, %42 : vector<32x288xf32>
    %c0_18 = arith.constant 0 : index
    %c0_19 = arith.constant 0 : index
    %44 = vector.load %arg7[%c0_18, %c0_19] : memref<32x9xf32, #tpu.memory_space<vmem>>, vector<32x9xf32>
    %45 = vector.extract_strided_slice %38 {offsets = [0, 0], sizes = [32, 256], strides = [1, 1]} : vector<32x288xf32> to vector<32x256xf32>
    %46 = vector.extract_strided_slice %44 {offsets = [0, 0], sizes = [32, 1], strides = [1, 1]} : vector<32x9xf32> to vector<32x1xf32>
    %47 = vector.broadcast %46 : vector<32x1xf32> to vector<32x256xf32>
    %48 = arith.mulf %45, %47 : vector<32x256xf32>
    %49 = vector.extract_strided_slice %39 {offsets = [0, 0], sizes = [32, 256], strides = [1, 1]} : vector<32x288xf32> to vector<32x256xf32>
    %50 = vector.extract_strided_slice %44 {offsets = [0, 1], sizes = [32, 1], strides = [1, 1]} : vector<32x9xf32> to vector<32x1xf32>
    %51 = vector.broadcast %50 : vector<32x1xf32> to vector<32x256xf32>
    %52 = arith.mulf %49, %51 : vector<32x256xf32>
    %53 = arith.addf %48, %52 : vector<32x256xf32>
    %54 = vector.extract_strided_slice %43 {offsets = [0, 0], sizes = [32, 256], strides = [1, 1]} : vector<32x288xf32> to vector<32x256xf32>
    %55 = vector.extract_strided_slice %44 {offsets = [0, 2], sizes = [32, 1], strides = [1, 1]} : vector<32x9xf32> to vector<32x1xf32>
    %56 = vector.broadcast %55 : vector<32x1xf32> to vector<32x256xf32>
    %57 = arith.mulf %54, %56 : vector<32x256xf32>
    %58 = arith.addf %53, %57 : vector<32x256xf32>
    %59 = vector.extract_strided_slice %38 {offsets = [0, 16], sizes = [32, 256], strides = [1, 1]} : vector<32x288xf32> to vector<32x256xf32>
    %60 = vector.extract_strided_slice %44 {offsets = [0, 3], sizes = [32, 1], strides = [1, 1]} : vector<32x9xf32> to vector<32x1xf32>
    %61 = vector.broadcast %60 : vector<32x1xf32> to vector<32x256xf32>
    %62 = arith.mulf %59, %61 : vector<32x256xf32>
    %63 = arith.addf %58, %62 : vector<32x256xf32>
    %64 = vector.extract_strided_slice %39 {offsets = [0, 16], sizes = [32, 256], strides = [1, 1]} : vector<32x288xf32> to vector<32x256xf32>
    %65 = vector.extract_strided_slice %44 {offsets = [0, 4], sizes = [32, 1], strides = [1, 1]} : vector<32x9xf32> to vector<32x1xf32>
    %66 = vector.broadcast %65 : vector<32x1xf32> to vector<32x256xf32>
    %67 = arith.mulf %64, %66 : vector<32x256xf32>
    %68 = arith.addf %63, %67 : vector<32x256xf32>
    %69 = vector.extract_strided_slice %43 {offsets = [0, 16], sizes = [32, 256], strides = [1, 1]} : vector<32x288xf32> to vector<32x256xf32>
    %70 = vector.extract_strided_slice %44 {offsets = [0, 5], sizes = [32, 1], strides = [1, 1]} : vector<32x9xf32> to vector<32x1xf32>
    %71 = vector.broadcast %70 : vector<32x1xf32> to vector<32x256xf32>
    %72 = arith.mulf %69, %71 : vector<32x256xf32>
    %73 = arith.addf %68, %72 : vector<32x256xf32>
    %74 = vector.extract_strided_slice %38 {offsets = [0, 32], sizes = [32, 256], strides = [1, 1]} : vector<32x288xf32> to vector<32x256xf32>
    %75 = vector.extract_strided_slice %44 {offsets = [0, 6], sizes = [32, 1], strides = [1, 1]} : vector<32x9xf32> to vector<32x1xf32>
    %76 = vector.broadcast %75 : vector<32x1xf32> to vector<32x256xf32>
    %77 = arith.mulf %74, %76 : vector<32x256xf32>
    %78 = arith.addf %73, %77 : vector<32x256xf32>
    %79 = vector.extract_strided_slice %39 {offsets = [0, 32], sizes = [32, 256], strides = [1, 1]} : vector<32x288xf32> to vector<32x256xf32>
    %80 = vector.extract_strided_slice %44 {offsets = [0, 7], sizes = [32, 1], strides = [1, 1]} : vector<32x9xf32> to vector<32x1xf32>
    %81 = vector.broadcast %80 : vector<32x1xf32> to vector<32x256xf32>
    %82 = arith.mulf %79, %81 : vector<32x256xf32>
    %83 = arith.addf %78, %82 : vector<32x256xf32>
    %84 = vector.extract_strided_slice %43 {offsets = [0, 32], sizes = [32, 256], strides = [1, 1]} : vector<32x288xf32> to vector<32x256xf32>
    %85 = vector.extract_strided_slice %44 {offsets = [0, 8], sizes = [32, 1], strides = [1, 1]} : vector<32x9xf32> to vector<32x1xf32>
    %86 = vector.broadcast %85 : vector<32x1xf32> to vector<32x256xf32>
    %87 = arith.mulf %84, %86 : vector<32x256xf32>
    %88 = arith.addf %83, %87 : vector<32x256xf32>
    %c0_20 = arith.constant 0 : index
    %c0_21 = arith.constant 0 : index
    %89 = vector.load %arg8[%c0_20, %c0_21] : memref<32x1xf32, #tpu.memory_space<vmem>>, vector<32x1xf32>
    %90 = vector.broadcast %89 : vector<32x1xf32> to vector<32x256xf32>
    %91 = arith.addf %88, %90 : vector<32x256xf32>
    %cst_22 = arith.constant 0.000000e+00 : f32
    %92 = vector.broadcast %cst_22 : f32 to vector<32x256xf32>
    %93 = arith.maximumf %91, %92 : vector<32x256xf32>
    %c0_23 = arith.constant 0 : index
    %c0_24 = arith.constant 0 : index
    %94 = vector.load %arg9[%c0_23, %c0_24] : memref<4x32xf32, #tpu.memory_space<vmem>>, vector<4x32xf32>
    %95 = arith.truncf %94 : vector<4x32xf32> to vector<4x32xbf16>
    %96 = arith.truncf %93 : vector<32x256xf32> to vector<32x256xbf16>
    %cst_25 = arith.constant dense<0.000000e+00> : vector<4x256xf32>
    %97 = tpu.matmul %95, %96, %cst_25 {dimension_numbers = #tpu.dot_dimension_numbers<[1], [0], [0], [1], [0, 0, 1, 1], [], []>} : vector<4x32xbf16>, vector<32x256xbf16>, vector<4x256xf32> -> vector<4x256xf32>
    %c0_26 = arith.constant 0 : index
    %c0_27 = arith.constant 0 : index
    %98 = vector.load %arg10[%c0_26, %c0_27] : memref<4x1xf32, #tpu.memory_space<vmem>>, vector<4x1xf32>
    %99 = vector.broadcast %98 : vector<4x1xf32> to vector<4x256xf32>
    %100 = arith.addf %97, %99 : vector<4x256xf32>
    %101 = vector.shape_cast %100 : vector<4x256xf32> to vector<1x4x256xf32>
    %c0_28 = arith.constant 0 : index
    %c0_29 = arith.constant 0 : index
    %c0_30 = arith.constant 0 : index
    %102 = vector.load %arg11[%c0_28, %c0_29, %c0_30] : memref<1x4x256xf32, #tpu.memory_space<vmem>>, vector<1x4x256xf32>
    tpu.vector_store %arg11[%c0_28, %c0_29, %c0_30], %101 {strides = array<i32>} : memref<1x4x256xf32, #tpu.memory_space<vmem>>, vector<1x4x256xf32>,
    return
  }
  func.func @transform_0(%arg0: i32, %arg1: i32) -> (i32, i32, i32) {
    %c0_i32 = arith.constant 0 : i32
    %c0_i32_0 = arith.constant 0 : i32
    return %arg0, %c0_i32, %arg1 : i32, i32, i32
  }
  func.func @transform_1(%arg0: i32, %arg1: i32) -> (i32, i32, i32, i32) {
    %c0_i32 = arith.constant 0 : i32
    %c0_i32_0 = arith.constant 0 : i32
    %c0_i32_1 = arith.constant 0 : i32
    return %arg0, %arg1, %c0_i32, %c0_i32_0 : i32, i32, i32, i32
  }
  func.func @transform_2(%arg0: i32, %arg1: i32) -> (i32, i32) {
    %c0_i32 = arith.constant 0 : i32
    %c0_i32_0 = arith.constant 0 : i32
    %c0_i32_1 = arith.constant 0 : i32
    return %c0_i32, %c0_i32_0 : i32, i32
  }
  func.func @transform_3(%arg0: i32, %arg1: i32) -> (i32, i32) {
    %c0_i32 = arith.constant 0 : i32
    %c0_i32_0 = arith.constant 0 : i32
    %c0_i32_1 = arith.constant 0 : i32
    return %c0_i32, %c0_i32_0 : i32, i32
  }
  func.func @transform_4(%arg0: i32, %arg1: i32) -> (i32, i32) {
    %c0_i32 = arith.constant 0 : i32
    %c0_i32_0 = arith.constant 0 : i32
    %c0_i32_1 = arith.constant 0 : i32
    return %c0_i32, %c0_i32_0 : i32, i32
  }
  func.func @transform_5(%arg0: i32, %arg1: i32) -> (i32, i32) {
    %c0_i32 = arith.constant 0 : i32
    %c0_i32_0 = arith.constant 0 : i32
    %c0_i32_1 = arith.constant 0 : i32
    return %c0_i32, %c0_i32_0 : i32, i32
  }
  func.func @transform_6(%arg0: i32, %arg1: i32) -> (i32, i32) {
    %c0_i32 = arith.constant 0 : i32
    %c0_i32_0 = arith.constant 0 : i32
    %c0_i32_1 = arith.constant 0 : i32
    return %c0_i32, %c0_i32_0 : i32, i32
  }
  func.func @transform_7(%arg0: i32, %arg1: i32) -> (i32, i32) {
    %c0_i32 = arith.constant 0 : i32
    %c0_i32_0 = arith.constant 0 : i32
    %c0_i32_1 = arith.constant 0 : i32
    return %c0_i32, %c0_i32_0 : i32, i32
  }
  func.func @transform_8(%arg0: i32, %arg1: i32) -> (i32, i32) {
    %c0_i32 = arith.constant 0 : i32
    %c0_i32_0 = arith.constant 0 : i32
    %c0_i32_1 = arith.constant 0 : i32
    return %c0_i32, %c0_i32_0 : i32, i32
  }
  func.func @transform_9(%arg0: i32, %arg1: i32) -> (i32, i32, i32) {
    %c0_i32 = arith.constant 0 : i32
    %c0_i32_0 = arith.constant 0 : i32
    return %arg0, %c0_i32, %arg1 : i32, i32, i32
  }
}

</mosaic_0001>

<bundles_post_ra>
// kernel: tpu_custom_call.1
= control target key start
LH: loop header
LB: loop body
LE: loop exit
PB: predicated region body
PF: predicated region fallthrough
CT: control target
= control target key end

     0   :  { %14 = vsyncpa [#allocation3], 0  ;;  %s2878_s0 = inlined_call_operand.vmem [shape: f32[2,4,256], index: 0, kind: input, shape index: {}]   ;;  %s2879_s1 = inlined_call_operand.vmem [shape: f32[2,1,4,32], index: 1, kind: input, shape index: {}]   ;;  %s2880_s2 = inlined_call_operand.vmem [shape: f32[2,288], index: 2, kind: input, shape index: {}]   ;;  %s2881_s3 = inlined_call_operand.vmem [shape: f32[32,4], index: 3, kind: input, shape index: {}]   ;;  %s2882_s4 = inlined_call_operand.vmem [shape: f32[32,1], index: 4, kind: input, shape index: {}]   ;;  %s2883_s5 = inlined_call_operand.vmem [shape: f32[32,9], index: 5, kind: input, shape index: {}]   ;;  %s2884_s6 = inlined_call_operand.vmem [shape: f32[32,1], index: 6, kind: input, shape index: {}]   ;;  %s2885_s7 = inlined_call_operand.vmem [shape: f32[4,32], index: 7, kind: input, shape index: {}]   ;;  %s2886_s8 = inlined_call_operand.vmem [shape: f32[4,1], index: 8, kind: input, shape index: {}]   ;;  %s2887_s9 = inlined_call_operand.hbm [shape: f32[2,4,256], index: 9, kind: output, shape index: {}]  }
   0x1   :  { %16 = vsyncpa [#allocation3 + $0x1], 0  ;;  %s1964_s30 = smov 0   ;;  %s1966_s10 = smov 0  }
   0x2   :  { %s1968_s11 = smov 0   ;;  %s1970_s12 = smov 0  }
   0x3   :  { %s1972_s13 = smov 0   ;;  %s1974_s14 = smov 0  }
   0x4 LB: > { %s1666_s15 = sadd.s32 4294967295, %s1890_s14   ;;  %s1667_s16 = sadd.s32 4294967294, %s1890_s14   ;;  %s1890_s14 = sphi %s1974_s14, %s22_s14   ;;  %s1886_s13 = sphi %s1972_s13, %s2944_s13   ;;  %s1882_s12 = sphi %s1970_s12, %s2943_s12   ;;  %s1878_s11 = sphi %s1968_s11, %s2942_s11   ;;  %s1874_s10 = sphi %s1966_s10, %s2941_s10   ;;  %s1870_s30 = sphi %s1964_s30, %s2940_s30  }
   0x5   : > { %s34_s17 = sadd.s32 1, %s1886_s13  ;;  %s246_s18 = sadd.s32 1, %s1878_s11 }
   0x6   : > { %p36_p0 = scmp.ge.s32.totalorder %s34_s17, 2  ;;  %p256_p1 = scmp.ne.s32.totalorder %s1878_s11, %s1874_s10 }
   0x7   : > { %p257_p2 = scmp.eq.s32.totalorder %s1666_s15, 1  ;;  %p262_p3 = scmp.ne.s32.totalorder %s1874_s10, %s1870_s30 }
   0x8   : > { %s2946_s17 = smov (%p36_p0, %s34_s17), 0  ;;  %p263_p5 = scmp.eq.s32.totalorder %s1667_s16, 1 }
   0x9   : > { %p2004_p4 = por %p257_p2, %p256_p1  ;;  %s241_s20 = ssub.s32 %s1886_s13, %s2946_s17 }
   0xa   : > { %p1670_p6 = scmp.ge.s32.totalorder %s1890_s14, 1  ;;  %p244_p7 = scmp.eq.s32.totalorder %s241_s20, 0 }
   0xb   : > { %p2011_p8 = por %p263_p5, %p262_p3  ;;  %p325_p9 = scmp.lt.s32.totalorder %s1890_s14, 3 }
   0xc   : > { %s2017_s22 = scalar_select %p244_p7, %s1878_s11, %s246_s18  }
   0xd   : > { %p326_p10 = pnand %p1670_p6, %p325_p9 }
   0xf   : > { %329 = sbr.rel (%p326_p10) target bundleno = 917 (0x395), region = 56 }
  0x16   : > { %v399_v0 = vld [vmem:[%s2882_s4 + $0x10] sm:$0xff]  ;;  %p373_p11 = scmp.lt.s32.totalorder %s1882_s12, 1  ;;  %v2888_v1 = vmov 0   ;;  %v391_v2 = vld [vmem:[%s2881_s3] sm:$0xff]  ;;  %v392_v3 = vld [vmem:[%s2881_s3 + $0x8] sm:$0xff]  ;;  %v1893_v5 = vmov 1   ;;  %v646_v10 = vlaneseq }
  0x17   : > { %1775 = vset.pattern.permute.xlu1 %v2888_v1  ;;  %473 = vmatprep.mubr.bf16.mxu0 %v2888_v1  ;;  %v395_v4 = vpack.c.bf16 %v392_v3, %v391_v2  ;;  %v400_v6 = vld [vmem:[%s2882_s4 + $0x18] sm:$0xff]  ;;  %vm427_vm0 = vcmask 31744   ;;  %v1894_v7 = vmov 0.0   ;;  %s1895_s18 = smov 1   ;;  %v2041_v8 = vld [vmem:[%s2883_s5] sm:$0xff]  ;;  %vm434_vm1 = vcmask 1041408  }
  0x18   : > { %419 = vperm.xlu1 %1775, %v399_v0   ;;  %s2032_s29 = scalar_select %p373_p11, %s1882_s12, 1  ;;  %1786 = vset.pattern.permute.xlu0 %v1893_v5  ;;  %v2049_v15 = vshrl.u32 %v646_v10, 7  ;;  %v2055_v16 = vld [vmem:[%s2883_s5 + $0x8] sm:$0xff]  ;;  %v1896_v17 = vmov 3   ;;  %v393_v20 = vld [vmem:[%s2881_s3 + $0x10] sm:$0xff]  ;;  %v394_v21 = vld [vmem:[%s2881_s3 + $0x18] sm:$0xff] }
  0x19   : > { %1777 = vrot.lane.b32.xlu0 %v1894_v7, %s1895_s18  ;;  %1694 = vmatprep.mubr.msk.bf16.mxu1 %vm427_vm0, %v395_v4  ;;  %v1680_v19 = vld [vmem:[%s2880_s2 + $0x1] ss:$2 sm:$0x7]  ;;  %v1897_v22 = vmov 2   ;;  %v2074_v24 = vpack.c.bf16 %v394_v21, %v393_v20  ;;  %v2080_v25 = vld [vmem:[%s2883_s5 + $0x10] sm:$0xff]  ;;  %s1898_s28 = smov 2  }
  0x1a   : > { %s1687_s20 = sshll.u32 %s2032_s29, 3  ;;  %v2891_v18 = vsub.s32 1, %v2049_v15  ;;  %v2088_v26 = vld [vmem:[%s2883_s5 + $0x18] sm:$0xff]  ;;  %v648_v27 = vsub.s32 0, %v2049_v15  ;;  %v1899_v28 = vmov 4   ;;  %v2890_v30 = vsub.s32 2, %v2049_v15 }
  0x1b   : > { %s380_s27 = scalar_lea.vmem %s2878_s0, %s1687_s20  ;;  %v1900_v32 = vmov 5   ;;  %v1901_v33 = vmov 8   ;;  %v1902_v34 = vmov 7   ;;  %v397_v35 = vld [vmem:[%s2882_s4] sm:$0xff]  ;;  %v398_v36 = vld [vmem:[%s2882_s4 + $0x8] sm:$0xff]  ;;  %v1903_v37 = vmov 6  }
  0x1c   : > { %424 = vperm.xlu1 %1775, %v400_v6   ;;  %v401_v9 = vld [vmem:[%s380_s27] sm:$0xff]  ;;  %v683_v23 = vrot.slane %v1680_v19, %v2891_v18  ;;  %v679_v29 = vrot.slane %v1680_v19, %v648_v27  ;;  %v687_v31 = vrot.slane %v1680_v19, %v2890_v30  ;;  %v1457_v38 = vld [vmem:[%s2884_s6 + $0x8] sm:$0xff]  ;;  %v1459_v39 = vld [vmem:[%s2884_s6 + $0x18] sm:$0xff]  ;;  %s1904_s23 = smov 17   ;;  %vm626_vm2 = vcmask 7168   ;;  %s1905_s24 = smov 127  }
  0x1d   : > { %v403_v11 = vcombine.high %v401_v9, %v401_v9  ;;  %v405_v12 = vpack.c.bf16 %v401_v9, %v401_v9  ;;  %745 = vperm.xlu0 %1786, %v2041_v8   ;;  %v1456_v40 = vld [vmem:[%s2884_s6] sm:$0xff]  ;;  %v1458_v41 = vld [vmem:[%s2884_s6 + $0x10] sm:$0xff]  ;;  %vm609_vm3 = vcmask 138240   ;;  %vm639_vm4 = vcmask 269312   ;;  %s1906_s27 = smov 111   ;;  %s2904_s15 = smov 126  }
  0x1e   : > { %vm694_vm5 = vcmask 15360   ;;  %s1909_s16 = smov 112   ;;  %s1911_s20 = smov 96   ;;  %vm808_vm6 = vcmask 1039360   ;;  %vm1075_vm7 = vcmask 908288   ;;  %vm1342_vm8 = vcmask 777216  }
  0x1f   : > { %v406_v13 = vpack.c.bf16 %v403_v11, %v403_v11  ;;  %v436_v14 = vsel %vm434_vm1, %v405_v12, 0  ;;  %s1674_s25 = sshll.u32 %s2032_s29, 2  ;;  %s2926_s29 = smov 95   ;;  %vm897_vm9 = vcmask 1031168   ;;  %vm986_vm10 = vcmask 916480  }
  0x20   : > { %1782 = vrot.lane.b32.xlu1 %v1894_v7, %s1895_s18  ;;  %s1910_s18 = smov 110   ;;  %vm1164_vm11 = vcmask 900096   ;;  %vm1253_vm12 = vcmask 785408   ;;  %vm1431_vm13 = vcmask 769024   ;;  %vm1508_vm14 = vcmask 261120  }
  0x21   : > { %1675 = vmatprep.subr.msk.bf16.mxu0 %vm434_vm1, %v406_v13  ;;  %1787 = vset.pattern.permute.xlu1 %v1893_v5 }
  0x22   : > { %442 = vmatpush1.bf16.msra.mxu0 %v436_v14  ;;  %1790 = vset.pattern.permute.xlu0 %v1896_v17 }
  0x23   : > { %923 = vperm.xlu0 %1790, %v2041_v8  }
  0x24   : > { %749 = vperm.xlu1 %1787, %v2055_v16  }
  0x25   : > { %1676 = vmatmul.mubr.msk.bf16.vlgmr.msra.gmra.mrb[0].mxu0 %vm427_vm0, %v395_v4 }
  0x26   : > { %483 = vmatprep.mubr.bf16.mxu0 %v2888_v1 }
  0x27   : > { %1791 = vset.pattern.permute.xlu0 %v1897_v22 }
  0x28   : > { %1788 = vset.pattern.permute.xlu1 %v1897_v22  ;;  %838 = vperm.xlu0 %1791, %v2055_v16  }
  0x29   : > { %834 = vperm.xlu1 %1788, %v2041_v8  }
  0x2c   : > { %690 = vrot.lane.b32.xlu0 %v683_v23, %s1898_s28 }
  0x2d   : > { %1677 = vmatmul.mubr.msk.bf16.gmra.mrb[4].mxu0 %vm427_vm0, %v2074_v24  ;;  %1789 = vset.pattern.permute.xlu1 %v1893_v5 }
  0x2e   : > { %753 = vperm.xlu1 %1789, %v2080_v25  }
  0x30   : > { %842 = vperm.xlu0 %1791, %v2080_v25  }
  0x32   : > { %757 = vperm.xlu1 %1789, %v2088_v26  }
  0x34   : > { %1795 = vset.pattern.permute.xlu0 %v1899_v28 }
  0x35   : > { %1016 = vperm.xlu0 %1795, %v2055_v16  }
  0x36   : > { %1792 = vset.pattern.permute.xlu1 %v1896_v17 }
  0x37   : > { %927 = vperm.xlu1 %1792, %v2055_v16  }
  0x39   : > { %1024 = vperm.xlu0 %1795, %v2088_v26  }
  0x3b   : > { %688 = vrot.lane.b32.xlu1 %v679_v29, %s1898_s28 }
  0x3c   : > { %1793 = vset.pattern.permute.xlu1 %v1897_v22 }
  0x3d   : > { %1799 = vset.pattern.permute.xlu0 %v1900_v32 }
  0x3e   : > { %1101 = vperm.xlu0 %1799, %v2041_v8  }
  0x3f   : > { %692 = vrot.lane.b32.xlu1 %v687_v31, %s1898_s28  ;;  %s2906_s28 = smov 95  }
  0x42   : > { %1109 = vperm.xlu0 %1799, %v2080_v25  }
  0x43   : > { %846 = vperm.xlu1 %1793, %v2088_v26  }
  0x46   : > { %1804 = vset.pattern.permute.xlu0 %v1901_v33 }
  0x47   : > { %1368 = vperm.xlu0 %1804, %v2041_v8   ;;  %1794 = vset.pattern.permute.xlu1 %v1899_v28 }
  0x48   : > { %1012 = vperm.xlu1 %1794, %v2041_v8  }
  0x4b   : > { %1805 = vset.pattern.permute.xlu0 %v1902_v34 }
  0x4c   : > { %1283 = vperm.xlu0 %1805, %v2055_v16   ;;  %1796 = vset.pattern.permute.xlu1 %v1896_v17 }
  0x4d   : > { %931 = vperm.xlu1 %1796, %v2080_v25  }
  0x50   : > { %1291 = vperm.xlu0 %1805, %v2088_v26  }
  0x51   : > { %935 = vperm.xlu1 %1796, %v2088_v26  }
  0x54   : > { %1808 = vset.pattern.permute.xlu0 %v2888_v1 }
  0x55   : > { %409 = vperm.xlu0 %1808, %v397_v35   ;;  %1797 = vset.pattern.permute.xlu1 %v1900_v32 }
  0x56   : > { %1105 = vperm.xlu1 %1797, %v2055_v16  }
  0x59   : > { %414 = vperm.xlu0 %1808, %v398_v36  }
  0x5a   : > { %1798 = vset.pattern.permute.xlu1 %v1899_v28 }
  0x5b   : > { %1020 = vperm.xlu1 %1798, %v2080_v25  }
  0x5d   : > { %718 = vperm.xlu0 %1808, %v2041_v8  }
  0x5f   : > { %1800 = vset.pattern.permute.xlu1 %v1903_v37 }
  0x60   : > { %1190 = vperm.xlu1 %1800, %v2041_v8  }
  0x61   : > { %733 = vperm.xlu0 %1808, %v2088_v26  }
  0x64   : > { %1194 = vperm.xlu1 %1800, %v2055_v16  }
  0x65   : > { %1467 = vperm.xlu0 %1808, %v1457_v38  }
  0x68   : > { %1801 = vset.pattern.permute.xlu1 %v1900_v32 }
  0x69   : > { %1477 = vperm.xlu0 %1808, %v1459_v39   ;;  %1113 = vperm.xlu1 %1801, %v2088_v26  }
  0x6d   : > { %1802 = vset.pattern.permute.xlu1 %v1902_v34 }
  0x6e   : > { %1279 = vperm.xlu1 %1802, %v2041_v8  }
  0x72   : > { %1803 = vset.pattern.permute.xlu1 %v1903_v37 }
  0x73   : > { %1198 = vperm.xlu1 %1803, %v2080_v25  }
  0x77   : > { %1202 = vperm.xlu1 %1803, %v2088_v26  }
  0x7b   : > { %1806 = vset.pattern.permute.xlu1 %v1901_v33 }
  0x7c   : > { %1372 = vperm.xlu1 %1806, %v2055_v16  }
  0x80   : > { %1807 = vset.pattern.permute.xlu1 %v1902_v34 }
  0x81   : > { %1287 = vperm.xlu1 %1807, %v2080_v25  }
  0x85   : > { %1809 = vset.pattern.permute.xlu1 %v1901_v33 }
  0x86   : > { %1376 = vperm.xlu1 %1809, %v2080_v25  }
  0x8a   : > { %1380 = vperm.xlu1 %1809, %v2088_v26  }
  0x8b   : > { %v2146_v42 = vpop.permute.xlu0 %1777 }
  0x8e   : > { %1810 = vset.pattern.permute.xlu1 %v2888_v1 }
  0x8f   : > { %723 = vperm.xlu1 %1810, %v2055_v16  }
  0x93   : > { %728 = vperm.xlu1 %1810, %v2080_v25  }
  0x97   : > { %1462 = vperm.xlu1 %1810, %v1456_v40   ;;  %v420_v46 = vpop.permute.xlu1 %419 }
  0x9b   : > { %1472 = vperm.xlu1 %1810, %v1458_v41   ;;  %v425_v48 = vpop.permute.xlu1 %424 }
  0x9c   : > { %v2148_v43 = vpop.permute.xlu0 %745 }
  0x9f   : > { %v2158_v50 = vpop.permute.xlu1 %1782 }
  0xa0   : > { %v1785_v1 = vunpack.i.h.bf16 %v2158_v50 }
  0xa2   : > { %v2150_v44 = vpop.permute.xlu0 %923 }
  0xa3   : > { %v2162_v52 = vpop.permute.xlu1 %749 }
  0xa7   : > { %v2152_v45 = vpop.permute.xlu0 %838 }
  0xa8   : > { %v2166_v54 = vpop.permute.xlu1 %834 }
  0xab   : > { %v2154_v47 = vpop.permute.xlu0 %690 }
  0xad   : > { %v2170_v56 = vpop.permute.xlu1 %753 }
  0xaf   : > { %v2156_v49 = vpop.permute.xlu0 %842 }
  0xb1   : > { %v2174_v58 = vpop.permute.xlu1 %757 }
  0xb4   : > { %v2160_v51 = vpop.permute.xlu0 %1016 }
  0xb6   : > { %v2178_v60 = vpop.permute.xlu1 %927 }
  0xb8   : > { %v2164_v53 = vpop.permute.xlu0 %1024 }
  0xba   : > { %v2182_v62 = vpop.permute.xlu1 %688 }
  0xbd   : > { %v2168_v55 = vpop.permute.xlu0 %1101 }
  0xbe   : > { %v2186_v0 = vpop.permute.xlu1 %692 }
  0xc1   : > { %v2172_v57 = vpop.permute.xlu0 %1109 }
  0xc2   : > { %v2188_v8 = vpop.permute.xlu1 %846 }
  0xc6   : > { %v2176_v59 = vpop.permute.xlu0 %1368 }
  0xc7   : > { %v2190_v14 = vpop.permute.xlu1 %1012 }
  0xcb   : > { %v2180_v61 = vpop.permute.xlu0 %1283 }
  0xcc   : > { %v2192_v23 = vpop.permute.xlu1 %931 }
  0xcf   : > { %v2184_v63 = vpop.permute.xlu0 %1291 }
  0xd0   : > { %v2194_v26 = vpop.permute.xlu1 %935 }
  0xd4   : > { %v410_v2 = vpop.permute.xlu0 %409 }
  0xd5   : > { %v2196_v28 = vpop.permute.xlu1 %1105 }
  0xd8   : > { %v415_v10 = vpop.permute.xlu0 %414 }
  0xda   : > { %v2198_v29 = vpop.permute.xlu1 %1020 }
  0xdc   : > { %v2220_v41 = vpop.permute.xlu0 %718 }
  0xdf   : > { %v2200_v31 = vpop.permute.xlu1 %1190 }
  0xe3   : > { %v2202_v32 = vpop.permute.xlu1 %1194 }
  0xe8   : > { %v2204_v33 = vpop.permute.xlu1 %1113 }
  0xed   : > { %v2206_v34 = vpop.permute.xlu1 %1279 }
  0xf2   : > { %v2208_v35 = vpop.permute.xlu1 %1198 }
  0xf6   : > { %v2210_v36 = vpop.permute.xlu1 %1202 }
  0xf8   : > { %v475_v3 = vpop.f32.mrb[0].mxu0 }
  0xf9   : > { %v476_v4 = vadd.f32 %v475_v3, %v410_v2  ;;  %v477_v5 = vpop.f32.mrb[1].mxu0 }
  0xfa   : > { %v478_v6 = vadd.f32 %v477_v5, %v410_v2  ;;  %v479_v7 = vpop.f32.mrb[2].mxu0  ;;  %v1779_v5 = vunpack.i.l.bf16 %v2146_v42 }
  0xfb   : > { %v481_v9 = vpop.f32.mrb[3].mxu0  ;;  %593 = vrot.lane.b32.xlu0 %v476_v4, %s1904_s23  ;;  %v480_v11 = vadd.f32 %v479_v7, %v415_v10  ;;  %v2212_v37 = vpop.permute.xlu1 %1372 }
  0xfc   : > { %595 = vrot.lane.b32.xlu1 %v478_v6, %s1904_s23  ;;  %v482_v12 = vadd.f32 %v481_v9, %v415_v10  ;;  %v2889_v9 = vunpack.i.h.bf16 %v2146_v42  ;;  %v627_v10 = vsel %vm626_vm2, 0.0, %v1779_v5 }
  0xff   : > { %597 = vrot.lane.b32.xlu0 %v480_v11, %s1904_s23 }
 0x100   : > { %v485_v13 = vpop.f32.mrb[4].mxu0  ;;  %599 = vrot.lane.b32.xlu1 %v482_v12, %s1904_s23  ;;  %v2214_v38 = vpop.permute.xlu1 %1287 }
 0x101   : > { %v486_v16 = vadd.f32 %v485_v13, %v420_v46  ;;  %v487_v17 = vpop.f32.mrb[5].mxu0 }
 0x102   : > { %v489_v19 = vpop.f32.mrb[6].mxu0  ;;  %v488_v22 = vadd.f32 %v487_v17, %v420_v46 }
 0x103   : > { %v490_v20 = vadd.f32 %v489_v19, %v425_v48  ;;  %v491_v21 = vpop.f32.mrb[7].mxu0 }
 0x104   : > { %601 = vrot.lane.b32.xlu1 %v486_v16, %s1904_s23  ;;  %v492_v25 = vadd.f32 %v491_v21, %v425_v48  ;;  %v2224_v48 = vpop.permute.xlu0 %733 }
 0x105   : > { %605 = vrot.lane.b32.xlu0 %v490_v20, %s1904_s23  ;;  %v2216_v39 = vpop.permute.xlu1 %1376  ;;  %2912 = vst [vmem:[#allocation7_spill] sm:$0xff] %v2224_v48  ;;  %v628_v20 = vsel %vm626_vm2, 0.0, %v2889_v9 }
 0x106   : > { %2910 = vst [vmem:[#allocation5_spill] sm:$0xff] %v2216_v39 }
 0x108   : > { %603 = vrot.lane.b32.xlu1 %v488_v22, %s1904_s23  ;;  %v2228_v3 = vpop.permute.xlu0 %1467 }
 0x109   : > { %607 = vrot.lane.b32.xlu0 %v492_v25, %s1904_s23  ;;  %v2218_v40 = vpop.permute.xlu1 %1380  ;;  %2914 = vst [vmem:[#allocation9_spill] sm:$0xff] %v2228_v3  ;;  %v1784_v25 = vunpack.i.l.bf16 %v2158_v50  ;;  %v630_v50 = vsel %vm626_vm2, 0.0, %v1785_v1  ;;  %s1912_s23 = smov 94  }
 0x10a   : > { %2911 = vst [vmem:[#allocation6_spill] sm:$0xff] %v2218_v40 }
 0x10b   : > { %v629_v30 = vsel %vm626_vm2, 0.0, %v1784_v25 }
 0x10c   : > { %v2233_v6 = vpop.permute.xlu0 %1477 }
 0x10d   : > { %2916 = vst [vmem:[#allocation11_spill] sm:$0xff] %v2233_v6 }
 0x10e   : > { %v2222_v46 = vpop.permute.xlu1 %723 }
 0x112   : > { %v2226_v2 = vpop.permute.xlu1 %728 }
 0x113   : > { %2913 = vst [vmem:[#allocation8_spill] sm:$0xff] %v2226_v2  ;;  %v2919_v2 = vsub.s32 2, %v2049_v15 }
 0x116   : > { %v2230_v4 = vpop.permute.xlu1 %1462 }
 0x117   : > { %2915 = vst [vmem:[#allocation10_spill] sm:$0xff] %v2230_v4  ;;  %v2316_v4 = vsel %vm694_vm5, %v2154_v47, %v2186_v0 }
 0x11a   : > { %v2235_v7 = vpop.permute.xlu1 %1472 }
 0x11b   : > { %2917 = vst [vmem:[#allocation12_spill] sm:$0xff] %v2235_v7 }
 0x16d   : > { %v594_v11 = vpop.permute.xlu0 %593 }
 0x16e   : > { %v2240_v12 = vsel %vm609_vm3, %v627_v10, %v594_v11  ;;  %v596_v13 = vpop.permute.xlu1 %595 }
 0x16f   : > { %v635_v16 = vsel %vm609_vm3, %v596_v13, %v1779_v5  ;;  %v760_v17 = vmul.f32 %v2148_v43, %v2240_v12  ;;  %v2286_v7 = vsel %vm609_vm3, %v594_v11, %v596_v13  ;;  %v2918_v11 = vsub.s32 1, %v2049_v15 }
 0x170   : > { %v2246_v19 = vsel %vm639_vm4, %v635_v16, 0.0  ;;  %v644_v16 = vld [vmem:[%s2880_s2] ss:$2 sm:$0x7]  ;;  %v761_v15 = vmul.f32 %v2148_v43, %v2286_v7 }
 0x171   : > { %784 = vrot.lane.b32.xlu1 %v760_v17, %s1905_s24  ;;  %v2252_v21 = vpop.permute.xlu0 %597  ;;  %v762_v22 = vmul.f32 %v2148_v43, %v2246_v19  ;;  %v1027_v17 = vmul.f32 %v2190_v14, %v2240_v12  ;;  %v2275_v9 = vrot.slane %v644_v16, %v648_v27  ;;  %v2304_v13 = vrot.slane %v644_v16, %v2918_v11 }
 0x172   : > { %v2259_v5 = vsel %vm609_vm3, %v628_v20, %v2252_v21  ;;  %v2261_v10 = vpop.permute.xlu1 %599  ;;  %v2308_v3 = vrot.slane %v644_v16, %v2919_v2 }
 0x173   : > { %788 = vrot.lane.b32.xlu0 %v762_v22, %s1905_s24  ;;  %v763_v20 = vmul.f32 %v2162_v52, %v2259_v5  ;;  %v1030_v2 = vmul.f32 %v2160_v51, %v2259_v5 }
 0x175   : > { %1051 = vrot.lane.b32.xlu1 %v1027_v17, %s1906_s27  ;;  %v1294_v17 = vmul.f32 %v2206_v34, %v2240_v12 }
 0x176   : > { %v602_v18 = vpop.permute.xlu1 %601 }
 0x177   : > { %v2280_v22 = vsel %vm609_vm3, %v629_v30, %v602_v18  ;;  %790 = vrot.lane.b32.xlu0 %v763_v20, %s1905_s24  ;;  %v606_v6 = vpop.permute.xlu0 %605  ;;  %v1029_v20 = vmul.f32 %v2190_v14, %v2246_v19 }
 0x178   : > { %v2290_v27 = vmul.f32 %v2275_v9, %v2280_v22  ;;  %v2293_v48 = vsel %vm609_vm3, %v630_v50, %v606_v6  ;;  %v2312_v50 = vsel %vm694_vm5, %v2182_v62, %v2154_v47 }
 0x179   : > { %v2297_v30 = vmul.f32 %v2275_v9, %v2293_v48  ;;  %1318 = vrot.lane.b32.xlu1 %v1294_v17, %s2906_s28 }
 0x17a   : > { %v604_v17 = vpop.permute.xlu1 %603 }
 0x17b   : > { %v2319_v40 = vsel %vm609_vm3, %v602_v18, %v604_v17  ;;  %v637_v39 = vsel %vm609_vm3, %v604_v17, %v1784_v25  ;;  %1055 = vrot.lane.b32.xlu0 %v1029_v20, %s1906_s27  ;;  %v608_v11 = vpop.permute.xlu0 %607 }
 0x17c   : > { %v2328_v16 = vsel %vm639_vm4, %v637_v39, 0.0  ;;  %v2332_v47 = vmul.f32 %v2304_v13, %v2319_v40  ;;  %v2336_v18 = vmul.f32 %v2312_v50, %v2319_v40  ;;  %v2339_v0 = vsel %vm609_vm3, %v606_v6, %v608_v11 }
 0x17d   : > { %v2343_v43 = vmul.f32 %v2316_v4, %v2328_v16  ;;  %v638_v25 = vsel %vm609_vm3, %v608_v11, %v1785_v1  ;;  %v2348_v39 = vmul.f32 %v2304_v13, %v2339_v0  ;;  %v2352_v20 = vmul.f32 %v2312_v50, %v2339_v0  ;;  %786 = vrot.lane.b32.xlu1 %v761_v15, %s1905_s24 }
 0x17e   : > { %v2356_v17 = vsel %vm639_vm4, %v638_v25, 0.0  ;;  %v1028_v11 = vmul.f32 %v2190_v14, %v2286_v7  ;;  %v1296_v15 = vmul.f32 %v2206_v34, %v2246_v19  ;;  %v2924_v25 = vunpack.i.h.bf16 %v2146_v42 }
 0x17f   : > { %2920 = vst [vmem:[#allocation13_spill] sm:$0xff] %v2348_v39  ;;  %2921 = vst [vmem:[#allocation14_spill] sm:$0xff] %v2352_v20  ;;  %v2360_v6 = vmul.f32 %v2308_v3, %v2356_v17  ;;  %v2364_v1 = vmul.f32 %v2316_v4, %v2356_v17  ;;  %1057 = vrot.lane.b32.xlu0 %v1030_v2, %s1906_s27  ;;  %v700_v2 = vmul.f32 %v2182_v62, %v2240_v12 }
 0x180   : > { %v636_v39 = vsel %vm609_vm3, %v2261_v10, %v2924_v25  ;;  %v1297_v14 = vmul.f32 %v2180_v61, %v2259_v5  ;;  %v2422_v20 = vmul.f32 %v2275_v9, %v2259_v5 }
 0x181   : > { %2922 = vst [vmem:[#allocation15_spill] sm:$0xff] %v2360_v6  ;;  %2923 = vst [vmem:[#allocation16_spill] sm:$0xff] %v2364_v1  ;;  %1053 = vrot.lane.b32.xlu1 %v1028_v11, %s1906_s27  ;;  %v1295_v6 = vmul.f32 %v2206_v34, %v2286_v7  ;;  %v2385_v11 = vsel %vm639_vm4, %v636_v39, 0.0  ;;  %v849_v42 = vmul.f32 %v2166_v54, %v700_v2 }
 0x182   : > { %v765_v34 = vmul.f32 %v2162_v52, %v2385_v11  ;;  %v2400_v39 = vmul.f32 %v2308_v3, %v2328_v16  ;;  %v663_v1 = vmul.f32 %v2308_v3, %v2246_v19 }
 0x183   : > { %1322 = vrot.lane.b32.xlu0 %v1296_v15, %s2906_s28  ;;  %v2391_v15 = vmul.f32 %v2275_v9, %v2240_v12  ;;  %v701_v9 = vmul.f32 %v2312_v50, %v2286_v7 }
 0x185   : > { %1320 = vrot.lane.b32.xlu1 %v1295_v6, %s2906_s28  ;;  %v702_v6 = vmul.f32 %v2316_v4, %v2246_v19  ;;  %v938_v25 = vmul.f32 %v2150_v44, %v2391_v15  ;;  %v611_v19 = vsel %vm609_vm3, %v2252_v21, %v2261_v10  ;;  %v850_v21 = vmul.f32 %v2166_v54, %v701_v9 }
 0x186   : > { %v2443_v10 = vmul.f32 %v2304_v13, %v2286_v7  ;;  %v1207_v7 = vmul.f32 %v2200_v31, %v663_v1 }
 0x187   : > { %1324 = vrot.lane.b32.xlu0 %v1297_v14, %s2906_s28  ;;  %v851_v12 = vmul.f32 %v2166_v54, %v702_v6  ;;  %v703_v14 = vmul.f32 %v2182_v62, %v2259_v5  ;;  %v1032_v5 = vmul.f32 %v2160_v51, %v2385_v11  ;;  %v1031_v54 = vmul.f32 %v2160_v51, %v611_v19 }
 0x188   : > { %v1299_v51 = vmul.f32 %v2180_v61, %v2385_v11 }
 0x189   : > { %873 = vrot.lane.b32.xlu1 %v849_v42, %s2904_s15  ;;  %v1116_v42 = vmul.f32 %v2168_v55, %v700_v2 }
 0x18b   : > { %794 = vrot.lane.b32.xlu0 %v765_v34, %s1905_s24  ;;  %v852_v34 = vmul.f32 %v2152_v45, %v703_v14 }
 0x18d   : > { %962 = vrot.lane.b32.xlu1 %v938_v25, %s1909_s16  ;;  %v1205_v25 = vmul.f32 %v2200_v31, %v2391_v15 }
 0x18f   : > { %877 = vrot.lane.b32.xlu0 %v851_v12, %s2904_s15  ;;  %v940_v12 = vmul.f32 %v2150_v44, %v663_v1  ;;  %v1298_v1 = vmul.f32 %v2180_v61, %v611_v19 }
 0x191   : > { %1140 = vrot.lane.b32.xlu1 %v1116_v42, %s1910_s18  ;;  %v1383_v42 = vmul.f32 %v2176_v59, %v700_v2  ;;  %v939_v2 = vmul.f32 %v2150_v44, %v2443_v10  ;;  %v1208_v44 = vmul.f32 %v2202_v32, %v2422_v20 }
 0x193   : > { %879 = vrot.lane.b32.xlu0 %v852_v34, %s2904_s15  ;;  %v941_v34 = vmul.f32 %v2178_v60, %v2422_v20 }
 0x195   : > { %1229 = vrot.lane.b32.xlu1 %v1205_v25, %s1911_s20  ;;  %v764_v25 = vmul.f32 %v2162_v52, %v611_v19  ;;  %v1118_v52 = vmul.f32 %v2168_v55, %v702_v6 }
 0x197   : > { %966 = vrot.lane.b32.xlu0 %v940_v12, %s1909_s16  ;;  %v1119_v12 = vmul.f32 %v2196_v28, %v703_v14 }
 0x199   : > { %1407 = vrot.lane.b32.xlu1 %v1383_v42, %s1912_s23  ;;  %v1117_v42 = vmul.f32 %v2168_v55, %v701_v9  ;;  %v1385_v55 = vmul.f32 %v2176_v59, %v702_v6 }
 0x19b   : > { %968 = vrot.lane.b32.xlu0 %v941_v34, %s1909_s16  ;;  %v1206_v34 = vmul.f32 %v2200_v31, %v2443_v10  ;;  %v1386_v31 = vmul.f32 %v2212_v37, %v703_v14 }
 0x19d   : > { %792 = vrot.lane.b32.xlu1 %v764_v25, %s1905_s24  ;;  %v704_v25 = vmul.f32 %v2312_v50, %v611_v19 }
 0x19f   : > { %1061 = vrot.lane.b32.xlu0 %v1032_v5, %s1906_s27  ;;  %v1384_v5 = vmul.f32 %v2176_v59, %v701_v9  ;;  %v853_v61 = vmul.f32 %v2152_v45, %v704_v25  ;;  %v666_v59 = vmul.f32 %v2308_v3, %v2385_v11  ;;  %v1120_v6 = vmul.f32 %v2196_v28, %v704_v25 }
 0x1a1   : > { %875 = vrot.lane.b32.xlu1 %v850_v21, %s2904_s15  ;;  %v705_v21 = vmul.f32 %v2316_v4, %v2385_v11 }
 0x1a3   : > { %1144 = vrot.lane.b32.xlu0 %v1118_v52, %s1910_s18  ;;  %v2479_v52 = vmul.f32 %v2304_v13, %v611_v19  ;;  %v854_v50 = vmul.f32 %v2152_v45, %v705_v21  ;;  %v943_v13 = vmul.f32 %v2178_v60, %v666_v59  ;;  %v1121_v45 = vmul.f32 %v2196_v28, %v705_v21 }
 0x1a4   : > { %v1387_v28 = vmul.f32 %v2212_v37, %v704_v25  ;;  %v1388_v9 = vmul.f32 %v2212_v37, %v705_v21  ;;  %v1033_v37 = vmul.f32 %v2198_v29, %v2280_v22  ;;  %v2567_v21 = vmul.f32 %v2182_v62, %v2293_v48 }
 0x1a5   : > { %964 = vrot.lane.b32.xlu1 %v939_v2, %s1909_s16  ;;  %v942_v4 = vmul.f32 %v2178_v60, %v2479_v52  ;;  %v1209_v3 = vmul.f32 %v2202_v32, %v2479_v52  ;;  %v1210_v60 = vmul.f32 %v2202_v32, %v666_v59  ;;  %v766_v32 = vmul.f32 %v2170_v56, %v2280_v22 }
 0x1a6   : > { %v768_v2 = vmul.f32 %v2170_v56, %v2328_v16  ;;  %v736_v59 = vmul.f32 %v2220_v41, %v2391_v15 }
 0x1a7   : > { %1146 = vrot.lane.b32.xlu0 %v1119_v12, %s1910_s18  ;;  %v2925_v12 = vmov 0  }
 0x1a9   : > { %1059 = vrot.lane.b32.xlu1 %v1031_v54, %s1906_s27  ;;  %v769_v54 = vmul.f32 %v2174_v58, %v2293_v48 }
 0x1ab   : > { %1233 = vrot.lane.b32.xlu0 %v1207_v7, %s1911_s20  ;;  %v1035_v7 = vmul.f32 %v2198_v29, %v2328_v16 }
 0x1ad   : > { %1142 = vrot.lane.b32.xlu1 %v1117_v42, %s1910_s18  ;;  %v767_v42 = vmul.f32 %v2170_v56, %v2319_v40 }
 0x1af   : > { %1235 = vrot.lane.b32.xlu0 %v1208_v44, %s1911_s20  ;;  %v1036_v44 = vmul.f32 %v2164_v53, %v2293_v48 }
 0x1b1   : > { %1231 = vrot.lane.b32.xlu1 %v1206_v34, %s1911_s20  ;;  %v1034_v34 = vmul.f32 %v2198_v29, %v2319_v40  ;;  %v1303_v29 = vmul.f32 %v2184_v63, %v2293_v48 }
 0x1b3   : > { %1328 = vrot.lane.b32.xlu0 %v1299_v51, %s2906_s28  ;;  %v1302_v51 = vmul.f32 %v2214_v38, %v2328_v16 }
 0x1b5   : > { %1326 = vrot.lane.b32.xlu1 %v1298_v1, %s2906_s28  ;;  %s388_s28 = scalar_lea.vmem %s2879_s1, %s1674_s25  ;;  %v2546_v1 = vmul.f32 %v2182_v62, %v2280_v22 }
 0x1b6   : > { %v494_v11 = vld [vmem:[%s388_s28] sm:$0xf]  ;;  %s2927_s28 = smov 126  }
 0x1b7   : > { %1411 = vrot.lane.b32.xlu0 %v1385_v55, %s1912_s23  ;;  %v495_v14 = vpack.c.bf16 %v494_v11, %v494_v11  ;;  %v1301_v55 = vmul.f32 %v2214_v38, %v2319_v40  ;;  %v855_v16 = vmul.f32 %v2156_v49, %v2546_v1  ;;  %v944_v40 = vmul.f32 %v2192_v23, %v2290_v27 }
 0x1b8   : > { %v1122_v62 = vmul.f32 %v2172_v57, %v2546_v1 }
 0x1b9   : > { %1409 = vrot.lane.b32.xlu1 %v1384_v5, %s1912_s23  ;;  %1698 = vmatprep.subr.msk.bf16.mxu1 %vm434_vm1, %v495_v14  ;;  %v497_v19 = vsel %vm434_vm1, %v495_v14, 0 }
 0x1ba   : > { %1693 = vmatpush3.bf16.msra.mxu1 %v497_v19  ;;  %v946_v19 = vmul.f32 %v2192_v23, %v2400_v39 }
 0x1bb   : > { %1413 = vrot.lane.b32.xlu0 %v1386_v31, %s1912_s23  ;;  %v771_v31 = vmul.f32 %v2174_v58, %v2356_v17 }
 0x1bd   : > { %881 = vrot.lane.b32.xlu1 %v853_v61, %s2904_s15  ;;  %1695 = vmatmul.mubr.msk.bf16.vlgmr.msra.gmra.mrb[0].mxu1 %vm427_vm0, %v2074_v24  ;;  %v1300_v24 = vmul.f32 %v2214_v38, %v2280_v22 }
 0x1be   : > { %1544 = vmatprep.mubr.bf16.mxu1 %v2925_v12 }
 0x1bf   : > { %883 = vrot.lane.b32.xlu0 %v854_v50, %s2904_s15  ;;  %v857_v50 = vmul.f32 %v2156_v49, %v2343_v43 }
 0x1c1   : > { %970 = vrot.lane.b32.xlu1 %v942_v4, %s1909_s16 }
 0x1c3   : > { %972 = vrot.lane.b32.xlu0 %v943_v13, %s1909_s16  ;;  %v737_v13 = vmul.f32 %v2220_v41, %v2443_v10  ;;  %v858_v41 = vmul.f32 %v2188_v8, %v2567_v21 }
 0x1c5   : > { %1148 = vrot.lane.b32.xlu1 %v1120_v6, %s1910_s18 }
 0x1c7   : > { %1150 = vrot.lane.b32.xlu0 %v1121_v45, %s1910_s18 }
 0x1c9   : > { %1237 = vrot.lane.b32.xlu1 %v1209_v3, %s1911_s20 }
 0x1cb   : > { %1239 = vrot.lane.b32.xlu0 %v1210_v60, %s1911_s20  ;;  %v1211_v60 = vmul.f32 %v2208_v35, %v2290_v27 }
 0x1cd   : > { %1415 = vrot.lane.b32.xlu1 %v1387_v28, %s1912_s23 }
 0x1cf   : > { %1417 = vrot.lane.b32.xlu0 %v1388_v9, %s1912_s23 }
 0x1d1   : > { %796 = vrot.lane.b32.xlu1 %v766_v32, %s1905_s24  ;;  %v770_v32 = vmul.f32 %v2174_v58, %v2339_v0 }
 0x1d3   : > { %800 = vrot.lane.b32.xlu0 %v768_v2, %s1905_s24 }
 0x1d5   : > { %1063 = vrot.lane.b32.xlu1 %v1033_v37, %s1906_s27 }
 0x1d7   : > { %802 = vrot.lane.b32.xlu0 %v769_v54, %s1905_s24  ;;  %v947_v54 = vmul.f32 %v2194_v26, %v2297_v30 }
 0x1d9   : > { %1330 = vrot.lane.b32.xlu1 %v1300_v24, %s2926_s29 }
 0x1db   : > { %1067 = vrot.lane.b32.xlu0 %v1035_v7, %s1906_s27  ;;  %v856_v7 = vmul.f32 %v2156_v49, %v2336_v18 }
 0x1dd   : > { %798 = vrot.lane.b32.xlu1 %v767_v42, %s1905_s24  ;;  %v1038_v42 = vmul.f32 %v2164_v53, %v2356_v17 }
 0x1df   : > { %1069 = vrot.lane.b32.xlu0 %v1036_v44, %s1906_s27 }
 0x1e1   : > { %1065 = vrot.lane.b32.xlu1 %v1034_v34, %s1906_s27  ;;  %v945_v34 = vmul.f32 %v2192_v23, %v2332_v47 }
 0x1e3   : > { %v785_v56 = vpop.permute.xlu1 %784  ;;  %1334 = vrot.lane.b32.xlu0 %v1302_v51, %s2926_s29 }
 0x1e5   : > { %1332 = vrot.lane.b32.xlu1 %v1301_v55, %s2926_s29  ;;  %v789_v25 = vpop.permute.xlu0 %788  ;;  %v1037_v55 = vmul.f32 %v2164_v53, %v2339_v0  ;;  %v1213_v53 = vmul.f32 %v2208_v35, %v2400_v39  ;;  %v1304_v39 = vmul.f32 %v2184_v63, %v2339_v0 }
 0x1e7   : > { %v1052_v5 = vpop.permute.xlu1 %1051  ;;  %1336 = vrot.lane.b32.xlu0 %v1303_v29, %s2926_s29  ;;  %v1125_v29 = vmul.f32 %v2204_v33, %v2567_v21 }
 0x1e9   : > { %885 = vrot.lane.b32.xlu1 %v855_v16, %s2927_s28  ;;  %v2558_v22 = vpop.permute.xlu0 %790 }
 0x1eb   : > { %v1319_v38 = vpop.permute.xlu1 %1318  ;;  %806 = vrot.lane.b32.xlu0 %v771_v31, %s1905_s24 }
 0x1ed   : > { %974 = vrot.lane.b32.xlu1 %v944_v40, %s1909_s16  ;;  %v1056_v61 = vpop.permute.xlu0 %1055 }
 0x1ef   : > { %v787_v4 = vpop.permute.xlu1 %786  ;;  %889 = vrot.lane.b32.xlu0 %v857_v50, %s2927_s28 }
 0x1f0   : > { %v809_v48 = vsel %vm808_vm6, %v785_v56, %v787_v4  ;;  %v810_v6 = vsel %vm808_vm6, %v787_v4, %v789_v25  ;;  %v1124_v56 = vmul.f32 %v2172_v57, %v2343_v43 }
 0x1f1   : > { %v2581_v45 = vadd.f32 %v809_v48, %v736_v59  ;;  %v2583_v3 = vadd.f32 %v810_v6, %v737_v13  ;;  %1152 = vrot.lane.b32.xlu1 %v1122_v62, %s1910_s18  ;;  %v2586_v15 = vpop.permute.xlu0 %1057  ;;  %v2928_v62 = vld [vmem:[#allocation5_spill] sm:$0xff] }
 0x1f2   : > { %v1390_v0 = vmul.f32 %v2928_v62, %v2336_v18 }
 0x1f3   : > { %v1054_v10 = vpop.permute.xlu1 %1053  ;;  %891 = vrot.lane.b32.xlu0 %v858_v41, %s2927_s28  ;;  %v1391_v41 = vmul.f32 %v2928_v62, %v2343_v43  ;;  %v2930_v43 = vld [vmem:[#allocation16_spill] sm:$0xff] }
 0x1f4   : > { %v2594_v11 = vsel %vm1075_vm7, %v1052_v5, %v1054_v10  ;;  %v2597_v14 = vsel %vm1075_vm7, %v1054_v10, %v1056_v61  ;;  %v1123_v5 = vmul.f32 %v2172_v57, %v2336_v18  ;;  %v1214_v57 = vmul.f32 %v2210_v36, %v2297_v30 }
 0x1f5   : > { %1241 = vrot.lane.b32.xlu1 %v1211_v60, %s1911_s20  ;;  %v1323_v28 = vpop.permute.xlu0 %1322  ;;  %v738_v61 = vmul.f32 %v2222_v46, %v2422_v20  ;;  %v1305_v20 = vmul.f32 %v2184_v63, %v2356_v17  ;;  %v2929_v60 = vld [vmem:[#allocation14_spill] sm:$0xff] }
 0x1f6   : > { %v859_v18 = vmul.f32 %v2188_v8, %v2929_v60 }
 0x1f7   : > { %v1321_v9 = vpop.permute.xlu1 %1320  ;;  %978 = vrot.lane.b32.xlu0 %v946_v19, %s1909_s16 }
 0x1f8   : > { %v2606_v2 = vsel %vm1342_vm8, %v1319_v38, %v1321_v9  ;;  %v2609_v12 = vsel %vm1342_vm8, %v1321_v9, %v1323_v28  ;;  %v1212_v38 = vmul.f32 %v2208_v35, %v2332_v47 }
 0x1f9   : > { %804 = vrot.lane.b32.xlu1 %v770_v32, %s1905_s24  ;;  %v2612_v37 = vpop.permute.xlu0 %1324 }
 0x1fb   : > { %v874_v24 = vpop.permute.xlu1 %873  ;;  %980 = vrot.lane.b32.xlu0 %v947_v54, %s1909_s16 }
 0x1fd   : > { %887 = vrot.lane.b32.xlu1 %v856_v7, %s2927_s28  ;;  %v2620_v58 = vpop.permute.xlu0 %794 }
 0x1ff   : > { %v963_v44 = vpop.permute.xlu1 %962  ;;  %1073 = vrot.lane.b32.xlu0 %v1038_v42, %s1906_s27 }
 0x201   : > { %976 = vrot.lane.b32.xlu1 %v945_v34, %s1909_s16  ;;  %v878_v51 = vpop.permute.xlu0 %877 }
 0x203   : > { %v1141_v49 = vpop.permute.xlu1 %1140  ;;  %1156 = vrot.lane.b32.xlu0 %v1124_v56, %s1910_s18 }
 0x205   : > { %1071 = vrot.lane.b32.xlu1 %v1037_v55, %s1906_s27  ;;  %v2634_v25 = vpop.permute.xlu0 %879 }
 0x207   : > { %v2638_v23 = vpop.permute.xlu1 %1229  ;;  %1158 = vrot.lane.b32.xlu0 %v1125_v29, %s1910_s18 }
 0x209   : > { %1154 = vrot.lane.b32.xlu1 %v1123_v5, %s1910_s18  ;;  %v967_v16 = vpop.permute.xlu0 %966 }
 0x20b   : > { %v2646_v31 = vpop.permute.xlu1 %1407  ;;  %1245 = vrot.lane.b32.xlu0 %v1213_v53, %s1911_s20 }
 0x20d   : > { %1243 = vrot.lane.b32.xlu1 %v1212_v38, %s1911_s20  ;;  %v2652_v40 = vpop.permute.xlu0 %968 }
 0x20f   : > { %v2658_v50 = vpop.permute.xlu1 %792  ;;  %1247 = vrot.lane.b32.xlu0 %v1214_v57, %s1911_s20 }
 0x210   : > { %v811_v35 = vsel %vm808_vm6, %v2558_v22, %v2658_v50 }
 0x211   : > { %v2666_v59 = vadd.f32 %v811_v35, %v738_v61  ;;  %1338 = vrot.lane.b32.xlu1 %v1304_v39, %s2926_s29  ;;  %v2669_v4 = vpop.permute.xlu0 %1061 }
 0x213   : > { %v876_v13 = vpop.permute.xlu1 %875  ;;  %1340 = vrot.lane.b32.xlu0 %v1305_v20, %s2926_s29 }
 0x214   : > { %v898_v48 = vsel %vm897_vm9, %v874_v24, %v876_v13  ;;  %v899_v22 = vsel %vm897_vm9, %v876_v13, %v878_v51  ;;  %v2931_v24 = vld [vmem:[#allocation13_spill] sm:$0xff]  ;;  %v2932_v51 = vld [vmem:[#allocation15_spill] sm:$0xff]  ;;  %v2933_v13 = vld [vmem:[#allocation6_spill] sm:$0xff] }
 0x215   : > { %1421 = vrot.lane.b32.xlu1 %v1390_v0, %s1912_s23  ;;  %v1145_v6 = vpop.permute.xlu0 %1144  ;;  %v914_v10 = vadd.f32 %v898_v48, %v2581_v45  ;;  %v915_v63 = vadd.f32 %v899_v22, %v2583_v3  ;;  %v860_v45 = vmul.f32 %v2188_v8, %v2930_v43  ;;  %v948_v7 = vmul.f32 %v2194_v26, %v2931_v24 }
 0x216   : > { %v949_v56 = vmul.f32 %v2194_v26, %v2932_v51  ;;  %v1126_v8 = vmul.f32 %v2204_v33, %v2929_v60  ;;  %v1215_v38 = vmul.f32 %v2210_v36, %v2931_v24  ;;  %v1393_v0 = vmul.f32 %v2933_v13, %v2929_v60 }
 0x217   : > { %v965_v17 = vpop.permute.xlu1 %964  ;;  %1423 = vrot.lane.b32.xlu0 %v1391_v41, %s1912_s23 }
 0x218   : > { %v987_v28 = vsel %vm986_vm10, %v963_v44, %v965_v17  ;;  %v988_v19 = vsel %vm986_vm10, %v965_v17, %v967_v16  ;;  %v812_v17 = vsel %vm808_vm6, %v2658_v50, %v2620_v58 }
 0x219   : > { %v1003_v9 = vadd.f32 %v987_v28, %v914_v10  ;;  %v1004_v32 = vadd.f32 %v988_v19, %v915_v63  ;;  %893 = vrot.lane.b32.xlu1 %v859_v18, %s2927_s28  ;;  %v2689_v54 = vpop.permute.xlu0 %1146 }
 0x21b   : > { %v2693_v3 = vpop.permute.xlu1 %1059  ;;  %895 = vrot.lane.b32.xlu0 %v860_v45, %s2927_s28  ;;  %v1092_v42 = vadd.f32 %v2594_v11, %v1003_v9  ;;  %v1093_v44 = vadd.f32 %v2597_v14, %v1004_v32  ;;  %v1127_v14 = vmul.f32 %v2204_v33, %v2930_v43  ;;  %v1216_v33 = vmul.f32 %v2210_v36, %v2932_v51 }
 0x21c   : > { %v1389_v36 = vmul.f32 %v2928_v62, %v2546_v1  ;;  %v739_v62 = vmul.f32 %v2222_v46, %v2479_v52 }
 0x21d   : > { %982 = vrot.lane.b32.xlu1 %v948_v7, %s1909_s16  ;;  %v1234_v34 = vpop.permute.xlu0 %1233 }
 0x21e   : > { %v828_v18 = vadd.f32 %v812_v17, %v739_v62  ;;  %v2936_v62 = vld [vmem:[#allocation8_spill] sm:$0xff] }
 0x21f   : > { %v1143_v55 = vpop.permute.xlu1 %1142  ;;  %984 = vrot.lane.b32.xlu0 %v949_v56, %s1909_s16 }
 0x220   : > { %v1165_v29 = vsel %vm1164_vm11, %v1141_v49, %v1143_v55  ;;  %v1166_v5 = vsel %vm1164_vm11, %v1143_v55, %v1145_v6  ;;  %v1394_v6 = vmul.f32 %v2933_v13, %v2930_v43 }
 0x221   : > { %1160 = vrot.lane.b32.xlu1 %v1126_v8, %s1910_s18  ;;  %v1236_v11 = vpop.permute.xlu0 %1235  ;;  %v1181_v16 = vadd.f32 %v1165_v29, %v1092_v42  ;;  %v1182_v53 = vadd.f32 %v1166_v5, %v1093_v44 }
 0x223   : > { %v1232_v26 = vpop.permute.xlu1 %1231  ;;  %1162 = vrot.lane.b32.xlu0 %v1127_v14, %s1910_s18  ;;  %s369_s18 = sand.u32 1, %s1874_s10  }
 0x224   : > { %v1254_v49 = vsel %vm1253_vm12, %v2638_v23, %v1232_v26  ;;  %v1255_v57 = vsel %vm1253_vm12, %v1232_v26, %v1234_v34  ;;  %s1559_s27 = scalar_lea.sflag [#allocation3], %s369_s18 }
 0x225   : > { %v1270_v61 = vadd.f32 %v1254_v49, %v1181_v16  ;;  %v1271_v39 = vadd.f32 %v1255_v57, %v1182_v53  ;;  %1249 = vrot.lane.b32.xlu1 %v1215_v38, %s1911_s20  ;;  %v1329_v35 = vpop.permute.xlu0 %1328  ;;  %v2934_v49 = vld [vmem:[#allocation10_spill] sm:$0xff] }
 0x227   : > { %v1327_v20 = vpop.permute.xlu1 %1326  ;;  %1251 = vrot.lane.b32.xlu0 %v1216_v33, %s1911_s20  ;;  %v1359_v48 = vadd.f32 %v2606_v2, %v1270_v61  ;;  %v1360_v23 = vadd.f32 %v2609_v12, %v1271_v39  ;;  %v1392_v2 = vmul.f32 %v2933_v13, %v2567_v21  ;;  %v1502_v12 = vld [vmem:[%s2886_s8] sm:$0xf]  ;;  %s1671_s20 = sshll.u32 %s369_s18, 3 }
 0x228   : > { %v1346_v26 = vsel %vm1342_vm8, %v1327_v20, %v1329_v35  ;;  %s371_s25 = scalar_lea.vmem [#allocation2], %s1671_s20 }
 0x229   : > { %1427 = vrot.lane.b32.xlu1 %v1393_v0, %s1912_s23  ;;  %v1412_v22 = vpop.permute.xlu0 %1411  ;;  %s1575_s26 = sshll.u32 %s371_s25, 4  ;;  %s2833_s26 = int_to_ptr.vmem [resolvable:$true] %s1575_s26 }
 0x22a   : > { %s1812_s15 = scalar_lea.vmem %s2833_s26, 128 }
 0x22b   : > { %v1410_v41 = vpop.permute.xlu1 %1409  ;;  %1429 = vrot.lane.b32.xlu0 %v1394_v6, %s1912_s23  ;;  %p1813_p12 = scmp.ne.s32.totalorder %s2833_s26, %s1812_s15 }
 0x22c   : > { %v1432_v44 = vsel %vm1431_vm13, %v2646_v31, %v1410_v41  ;;  %v1433_v56 = vsel %vm1431_vm13, %v1410_v41, %v1412_v22 }
 0x22d   : > { %1419 = vrot.lane.b32.xlu1 %v1389_v36, %s1912_s23  ;;  %v1414_v10 = vpop.permute.xlu0 %1413  ;;  %v1448_v8 = vadd.f32 %v1432_v44, %v1359_v48  ;;  %v1449_v14 = vadd.f32 %v1433_v56, %v1360_v23  ;;  %v2937_v56 = vld [vmem:[#allocation7_spill] sm:$0xff]  ;;  %p1814_p13 = pnand %p1813_p12, %p2004_p4 }
 0x22f   : > { %v882_v63 = vpop.permute.xlu1 %881  ;;  %1425 = vrot.lane.b32.xlu0 %v1392_v2, %s1912_s23  ;;  %v1480_v57 = vadd.f32 %v2934_v49, %v1448_v8  ;;  %v1481_v13 = vadd.f32 %v2934_v49, %v1449_v14  ;;  %s1688_s23 = sshll.u32 %s1882_s12, 7  ;;  %p1815_p0 = pneg %p1814_p13 }
 0x230   : > { %v900_v1 = vsel %vm897_vm9, %v2634_v25, %v882_v63  ;;  %v1078_v25 = vsel %vm1075_vm7, %v2586_v15, %v2693_v3  ;;  %s2831_s24 = scalar_lea.hbm %s2887_s9, %s1688_s23  ;;  %s1913_s12 = smov [#allocation2]  }
 0x231   : > { %1505 = vperm.xlu1 %1810, %v1502_v12   ;;  %v884_v60 = vpop.permute.xlu0 %883  ;;  %v916_v28 = vadd.f32 %v900_v1, %v2666_v59  ;;  %v1079_v59 = vsel %vm1075_vm7, %v2693_v3, %v2669_v4  ;;  %v1488_v22 = vmax.f32 %v1480_v57, 0.0  ;;  %s1816_s16 = sshll.u32 %s1913_s12, 4  ;;  %s1817_s16 = int_to_ptr.vmem [resolvable:$false] %s1816_s16 }
 0x232   : > { %v901_v21 = vsel %vm897_vm9, %v882_v63, %v884_v60  ;;  %v740_v60 = vmul.f32 %v2936_v62, %v2290_v27  ;;  %s1818_s20 = scalar_lea.vmem %s1817_s16, 256  ;;  %p1819_p1 = scmp.lt.s32.totalorder %s2833_s26, %s1817_s16 }
 0x233   : > { %v971_v19 = vpop.permute.xlu1 %970  ;;  %v917_v32 = vadd.f32 %v901_v21, %v828_v18  ;;  %v741_v21 = vmul.f32 %v2936_v62, %v2332_v47  ;;  %p1820_p2 = scmp.lt.s32.totalorder %s1818_s20, %s1812_s15 }
 0x234   : > { %v989_v9 = vsel %vm986_vm10, %v2652_v40, %v971_v19 }
 0x235   : > { %v1005_v43 = vadd.f32 %v989_v9, %v916_v28  ;;  %v973_v58 = vpop.permute.xlu0 %972  ;;  %p1821_p3 = por %p1820_p2, %p1819_p1 }
 0x236   : > { %v990_v46 = vsel %vm986_vm10, %v971_v19, %v973_v58 }
 0x237   : > { %v1006_v52 = vadd.f32 %v990_v46, %v917_v32  ;;  %v1149_v50 = vpop.permute.xlu1 %1148  ;;  %v1094_v45 = vadd.f32 %v1078_v25, %v1005_v43  ;;  %p1822_p5 = pnand %p1821_p3, %p1815_p0 }
 0x238   : > { %v1167_v40 = vsel %vm1164_vm11, %v2689_v54, %v1149_v50  ;;  %v1345_v54 = vsel %vm1342_vm8, %v2612_v37, %v1327_v20  ;;  %v2935_v37 = vld [vmem:[#allocation9_spill] sm:$0xff]  ;;  %v1489_v20 = vmax.f32 %v1481_v13, 0.0 }
 0x239   : > { %v1095_v7 = vadd.f32 %v1079_v59, %v1006_v52  ;;  %v1151_v42 = vpop.permute.xlu0 %1150  ;;  %v1183_v34 = vadd.f32 %v1167_v40, %v1094_v45 }
 0x23a   : > { %v1168_v15 = vsel %vm1164_vm11, %v1149_v50, %v1151_v42 }
 0x23b   : > { %v1238_v51 = vpop.permute.xlu1 %1237  ;;  %v1184_v29 = vadd.f32 %v1168_v15, %v1095_v7 }
 0x23c   : > { %v1256_v55 = vsel %vm1253_vm12, %v1236_v11, %v1238_v51 }
 0x23d   : > { %v1272_v5 = vadd.f32 %v1256_v55, %v1183_v34  ;;  %v1240_v4 = vpop.permute.xlu0 %1239  ;;  %v742_v55 = vmul.f32 %v2937_v56, %v2297_v30 }
 0x23e   : > { %v1257_v3 = vsel %vm1253_vm12, %v1238_v51, %v1240_v4 }
 0x23f   : > { %v1273_v16 = vadd.f32 %v1257_v3, %v1184_v29  ;;  %v1416_v31 = vpop.permute.xlu1 %1415  ;;  %v1361_v53 = vadd.f32 %v1345_v54, %v1272_v5 }
 0x240   : > { %v1434_v38 = vsel %vm1431_vm13, %v1414_v10, %v1416_v31 }
 0x241   : > { %v1450_v11 = vadd.f32 %v1434_v38, %v1361_v53  ;;  %v1362_v61 = vadd.f32 %v1346_v26, %v1273_v16  ;;  %v1418_v39 = vpop.permute.xlu0 %1417 }
 0x242   : > { %v1435_v33 = vsel %vm1431_vm13, %v1416_v31, %v1418_v39 }
 0x243   : > { %v1482_v0 = vadd.f32 %v2935_v37, %v1450_v11  ;;  %v1451_v48 = vadd.f32 %v1435_v33, %v1362_v61  ;;  %v797_v23 = vpop.permute.xlu1 %796 }
 0x245   : > { %v1490_v6 = vmax.f32 %v1482_v0, 0.0  ;;  %v1483_v41 = vadd.f32 %v2935_v37, %v1451_v48  ;;  %v801_v35 = vpop.permute.xlu0 %800 }
 0x247   : > { %v1498_v36 = vpack.c.bf16 %v1490_v6, %v1488_v22  ;;  %v1491_v10 = vmax.f32 %v1483_v41, 0.0  ;;  %v1064_v2 = vpop.permute.xlu1 %1063 }
 0x249   : > { %v803_v12 = vpop.permute.xlu0 %802  ;;  %v1499_v63 = vpack.c.bf16 %v1491_v10, %v1489_v20 }
 0x24b   : > { %v1331_v17 = vpop.permute.xlu1 %1330  ;;  %1512 = vmatprep.subr.bf16.mxu1 %v1499_v63 }
 0x24c   : > { %1513 = vmatpush1.bf16.msra.mxu1 %v1498_v36 }
 0x24d   : > { %v1068_v1 = vpop.permute.xlu0 %1067 }
 0x24f   : > { %v799_v18 = vpop.permute.xlu1 %798 }
 0x250   : > { %v813_v28 = vsel %vm808_vm6, %v797_v23, %v799_v18  ;;  %v814_v19 = vsel %vm808_vm6, %v799_v18, %v801_v35 }
 0x251   : > { %v829_v9 = vadd.f32 %v813_v28, %v740_v60  ;;  %v830_v32 = vadd.f32 %v814_v19, %v741_v21  ;;  %v2779_v43 = vpop.permute.xlu0 %1069  ;;  %v743_v19 = vmul.f32 %v2937_v56, %v2931_v24 }
 0x253   : > { %v1066_v58 = vpop.permute.xlu1 %1065 }
 0x254   : > { %v1080_v25 = vsel %vm1075_vm7, %v1064_v2, %v1066_v58  ;;  %v1081_v46 = vsel %vm1075_vm7, %v1066_v58, %v1068_v1 }
 0x255   : > { %v1335_v52 = vpop.permute.xlu0 %1334 }
 0x257   : > { %v1333_v50 = vpop.permute.xlu1 %1332 }
 0x258   : > { %v1347_v27 = vsel %vm1342_vm8, %v1331_v17, %v1333_v50  ;;  %v1348_v47 = vsel %vm1342_vm8, %v1333_v50, %v1335_v52 }
 0x259   : > { %v2785_v45 = vpop.permute.xlu0 %1336 }
 0x25b   : > { %v886_v59 = vpop.permute.xlu1 %885 }
 0x25d   : > { %v807_v40 = vpop.permute.xlu0 %806 }
 0x25f   : > { %v975_v7 = vpop.permute.xlu1 %974 }
 0x261   : > { %v890_v42 = vpop.permute.xlu0 %889 }
 0x263   : > { %v1153_v44 = vpop.permute.xlu1 %1152 }
 0x265   : > { %v892_v15 = vpop.permute.xlu0 %891 }
 0x267   : > { %v1242_v34 = vpop.permute.xlu1 %1241 }
 0x269   : > { %v979_v51 = vpop.permute.xlu0 %978 }
 0x26b   : > { %v805_v8 = vpop.permute.xlu1 %804 }
 0x26c   : > { %v815_v29 = vsel %vm808_vm6, %v803_v12, %v805_v8  ;;  %v816_v18 = vsel %vm808_vm6, %v805_v8, %v807_v40 }
 0x26d   : > { %v831_v5 = vadd.f32 %v815_v29, %v742_v55  ;;  %v981_v4 = vpop.permute.xlu0 %980  ;;  %v832_v58 = vadd.f32 %v816_v18, %v743_v19 }
 0x26f   : > { %v888_v54 = vpop.permute.xlu1 %887 }
 0x270   : > { %v902_v3 = vsel %vm897_vm9, %v886_v59, %v888_v54  ;;  %v903_v14 = vsel %vm897_vm9, %v888_v54, %v890_v42 }
 0x271   : > { %v1074_v16 = vpop.permute.xlu0 %1073  ;;  %v918_v31 = vadd.f32 %v902_v3, %v829_v9  ;;  %v919_v53 = vadd.f32 %v903_v14, %v830_v32 }
 0x273   : > { %v977_v26 = vpop.permute.xlu1 %976 }
 0x274   : > { %v991_v38 = vsel %vm986_vm10, %v975_v7, %v977_v26  ;;  %v992_v49 = vsel %vm986_vm10, %v977_v26, %v979_v51 }
 0x275   : > { %v1007_v57 = vadd.f32 %v991_v38, %v918_v31  ;;  %v1008_v30 = vadd.f32 %v992_v49, %v919_v53  ;;  %v1157_v11 = vpop.permute.xlu0 %1156 }
 0x277   : > { %v1072_v61 = vpop.permute.xlu1 %1071  ;;  %v1096_v39 = vadd.f32 %v1080_v25, %v1007_v57  ;;  %v1097_v33 = vadd.f32 %v1081_v46, %v1008_v30 }
 0x278   : > { %v1082_v59 = vsel %vm1075_vm7, %v2779_v43, %v1072_v61  ;;  %v1083_v24 = vsel %vm1075_vm7, %v1072_v61, %v1074_v16 }
 0x279   : > { %v1159_v13 = vpop.permute.xlu0 %1158 }
 0x27b   : > { %v1155_v37 = vpop.permute.xlu1 %1154 }
 0x27c   : > { %v1169_v0 = vsel %vm1164_vm11, %v1153_v44, %v1155_v37  ;;  %v1170_v48 = vsel %vm1164_vm11, %v1155_v37, %v1157_v11  ;;  %v2938_v11 = vld [vmem:[#allocation12_spill] sm:$0xff]  ;;  %v2939_v37 = vld [vmem:[#allocation11_spill] sm:$0xff] }
 0x27d   : > { %v1246_v23 = vpop.permute.xlu0 %1245  ;;  %v1185_v22 = vadd.f32 %v1169_v0, %v1096_v39  ;;  %v1186_v6 = vadd.f32 %v1170_v48, %v1097_v33 }
 0x27f   : > { %v1244_v41 = vpop.permute.xlu1 %1243 }
 0x280   : > { %v1258_v35 = vsel %vm1253_vm12, %v1242_v34, %v1244_v41  ;;  %v1259_v20 = vsel %vm1253_vm12, %v1244_v41, %v1246_v23 }
 0x281   : > { %v1274_v36 = vadd.f32 %v1258_v35, %v1185_v22  ;;  %v1275_v10 = vadd.f32 %v1259_v20, %v1186_v6  ;;  %v1248_v2 = vpop.permute.xlu0 %1247 }
 0x283   : > { %v1339_v12 = vpop.permute.xlu1 %1338  ;;  %v1364_v63 = vadd.f32 %v1348_v47, %v1275_v10  ;;  %v1363_v17 = vadd.f32 %v1347_v27, %v1274_v36 }
 0x284   : > { %v1349_v3 = vsel %vm1342_vm8, %v2785_v45, %v1339_v12 }
 0x285   : > { %v1341_v1 = vpop.permute.xlu0 %1340 }
 0x286   : > { %v1350_v38 = vsel %vm1342_vm8, %v1339_v12, %v1341_v1 }
 0x287   : > { %v1422_v62 = vpop.permute.xlu1 %1421 }
 0x289   : > { %v1424_v60 = vpop.permute.xlu0 %1423 }
 0x28a   : > { %v1437_v29 = vsel %vm1431_vm13, %v1422_v62, %v1424_v60 }
 0x28b   : > { %v894_v21 = vpop.permute.xlu1 %893  ;;  %v1453_v16 = vadd.f32 %v1437_v29, %v1364_v63 }
 0x28c   : > { %v904_v28 = vsel %vm897_vm9, %v892_v15, %v894_v21 }
 0x28d   : > { %v896_v9 = vpop.permute.xlu0 %895  ;;  %v920_v25 = vadd.f32 %v904_v28, %v831_v5  ;;  %v1485_v61 = vadd.f32 %v2938_v11, %v1453_v16 }
 0x28e   : > { %v905_v32 = vsel %vm897_vm9, %v894_v21, %v896_v9 }
 0x28f   : > { %v983_v46 = vpop.permute.xlu1 %982  ;;  %v921_v50 = vadd.f32 %v905_v32, %v832_v58  ;;  %v1493_v22 = vmax.f32 %v1485_v61, 0.0 }
 0x290   : > { %v993_v52 = vsel %vm986_vm10, %v981_v4, %v983_v46  ;;  %v1696_v20 = vpop.f32.mrb[0].mxu1 }
 0x291   : > { %v1009_v27 = vadd.f32 %v993_v52, %v920_v25  ;;  %v985_v47 = vpop.permute.xlu0 %984  ;;  %v533_v36 = vpop.f32.mrb[1].mxu1 }
 0x292   : > { %v994_v40 = vsel %vm986_vm10, %v983_v46, %v985_v47  ;;  %v1697_v12 = vpop.f32.mrb[2].mxu1 }
 0x293   : > { %v1010_v7 = vadd.f32 %v994_v40, %v921_v50  ;;  %v1161_v42 = vpop.permute.xlu1 %1160  ;;  %v1098_v44 = vadd.f32 %v1082_v59, %v1009_v27  ;;  %v536_v63 = vpop.f32.mrb[3].mxu1 }
 0x294   : > { %v1171_v15 = vsel %vm1164_vm11, %v1159_v13, %v1161_v42 }
 0x295   : > { %v1099_v34 = vadd.f32 %v1083_v24, %v1010_v7  ;;  %v1163_v51 = vpop.permute.xlu0 %1162  ;;  %v1187_v55 = vadd.f32 %v1171_v15, %v1098_v44 }
 0x296   : > { %v1172_v56 = vsel %vm1164_vm11, %v1161_v42, %v1163_v51 }
 0x297   : > { %v1250_v8 = vpop.permute.xlu1 %1249  ;;  %v1188_v43 = vadd.f32 %v1172_v56, %v1099_v34 }
 0x298   : > { %v1260_v5 = vsel %vm1253_vm12, %v1248_v2, %v1250_v8 }
 0x299   : > { %v1276_v4 = vadd.f32 %v1260_v5, %v1187_v55  ;;  %v1252_v54 = vpop.permute.xlu0 %1251 }
 0x29a   : > { %v1261_v14 = vsel %vm1253_vm12, %v1250_v8, %v1252_v54 }
 0x29b   : > { %v1277_v31 = vadd.f32 %v1261_v14, %v1188_v43  ;;  %v1428_v53 = vpop.permute.xlu1 %1427  ;;  %v1365_v26 = vadd.f32 %v1349_v3, %v1276_v4 }
 0x29d   : > { %v1366_v49 = vadd.f32 %v1350_v38, %v1277_v31  ;;  %v1430_v57 = vpop.permute.xlu0 %1429 }
 0x29e   : > { %v1439_v30 = vsel %vm1431_vm13, %v1428_v53, %v1430_v57 }
 0x29f   : > { %v1455_v39 = vadd.f32 %v1439_v30, %v1366_v49  ;;  %v1420_v33 = vpop.permute.xlu1 %1419 }
 0x2a0   : > { %v1436_v13 = vsel %vm1431_vm13, %v1420_v33, %v1422_v62 }
 0x2a1   : > { %v1487_v45 = vadd.f32 %v2939_v37, %v1455_v39  ;;  %v1452_v0 = vadd.f32 %v1436_v13, %v1363_v17  ;;  %v1426_v48 = vpop.permute.xlu0 %1425  ;;  %v1496_v17 = vld [vmem:[%s2885_s7] sm:$0xf] }
 0x2a2   : > { %v1438_v23 = vsel %vm1431_vm13, %v1426_v48, %v1428_v53  ;;  %v1497_v21 = vpack.c.bf16 %v1496_v17, %v1496_v17 }
 0x2a3   : > { %v1495_v6 = vmax.f32 %v1487_v45, 0.0  ;;  %v1484_v41 = vadd.f32 %v2938_v11, %v1452_v0  ;;  %v1454_v35 = vadd.f32 %v1438_v23, %v1365_v26 }
 0x2a5   : > { %v1486_v10 = vadd.f32 %v2939_v37, %v1454_v35  ;;  %v1501_v2 = vpack.c.bf16 %v1495_v6, %v1493_v22  ;;  %v1492_v1 = vmax.f32 %v1484_v41, 0.0 }
 0x2a7   : > { %v1494_v62 = vmax.f32 %v1486_v10, 0.0  ;;  %1514 = vmatprep.subr.bf16.mxu1 %v1501_v2 }
 0x2a9   : > { %v1500_v60 = vpack.c.bf16 %v1494_v62, %v1492_v1 }
 0x2ab   : > { %1515 = vmatpush1.bf16.msra.mxu1 %v1500_v60 }
 0x2ae   : > { %1681 = vmatmul.mubr.msk.bf16.vlgmr.msra.gmra.mrb[4].mxu1 %vm1508_vm14, %v1497_v21 }
 0x2b0   : > { %v1506_v18 = vpop.permute.xlu1 %1505 }
 0x381   : > { %v1546_v28 = vpop.f32.mrb[4].mxu1 }
 0x382   : > { %v1547_v19 = vadd.f32 %v1546_v28, %v1506_v18  ;;  %v1548_v9 = vpop.f32.mrb[5].mxu1 }
 0x383   : > { %v1549_v32 = vadd.f32 %v1548_v9, %v1506_v18  ;;  %v1550_v58 = vpop.f32.mrb[6].mxu1 }
 0x384   : > { %v1551_v25 = vpop.f32.mrb[7].mxu1 }
 0x385   : > { %v1555_v46 = vcombine.low %v1547_v19, %v1549_v32 }
 0x387   : > { %1557 = vst [vmem:[%s371_s25] sm:$0xff] %v1555_v46 }
 0x388   : > { %1825 = shalt.err (!%p1822_p5)
}
 0x389   : > { %s1826_s18 = scalar_lea.hbm %s2831_s24, 128  ;;  %s1830_s29 = scalar_lea.hbm %s2887_s9, 256 }
 0x38a   : > { %p1827_p6 = scmp.ne.s32.totalorder %s2831_s24, %s1826_s18  ;;  %p1831_p10 = scmp.lt.u32.totalorder %s2831_s24, %s2887_s9 }
 0x38b   : > { %p1832_p11 = scmp.lt.u32.totalorder %s1830_s29, %s1826_s18  ;;  %p1834_p13 = scmp.lt.u32.totalorder %s1826_s18, %s2831_s24 }
 0x38c   : > { %p1828_p7 = pnand %p1827_p6, %p2004_p4 }
 0x38d   : > { %p1833_p12 = por %p1832_p11, %p1831_p10 }
 0x38e   : > { %p1829_p9 = pneg %p1828_p7 }
 0x38f   : > { %p1835_p0 = por %p1834_p13, %p1833_p12 }
 0x391   : > { %p1836_p1 = pnand %p1835_p0, %p1829_p9 }
 0x393   : > { %1839 = shalt.err (!%p1836_p1)
}
 0x394   : > { %1699 = dma.vmem_to_hbm [thread:$0]  (%p2004_p4), %s2833_s26, 128, %s2831_s24, %s1559_s27  }
 0x395 PF: > { %p1705_p2 = scmp.ge.s32.totalorder %s1890_s14, 2  ;;  %s1587_s15 = sand.u32 1, %s1870_s30  }
 0x396   : > { %s1588_s16 = scalar_lea.sflag [#allocation3], %s1587_s15 }
 0x397   : > { %p1702_p3 = pnand %p1705_p2, %p2011_p8 }
 0x399   : > { %1865 = dma.done.wait (!%p1702_p3), %s1588_s16, 128  }
 0x39a   : > { %1867 = vsyncadd (!%p1702_p3), %s1588_s16, 4294967168  ;;  %s22_s14 = sadd.s32 1, %s1890_s14   ;;  %s2940_s30 = smov %s1874_s10 }
 0x39b   : > { %p19_p5 = scmp.ge.s32.totalorder %s22_s14, 4   ;;  %s2941_s10 = smov %s1878_s11 }
 0x39c   : > { %s2942_s11 = smov %s2017_s22  ;;  %s2943_s12 = smov %s1886_s13 }
 0x39d   : > { %s2944_s13 = smov %s2946_s17  ;;  %21 = sbr.rel (!%p19_p5) target bundleno = 4 (0x4), region = 95 }
 0x3a4   :  { %1593 = vsyncpa [#allocation3], 1 }
 0x3a5   :  { %1595 = vsyncpa [#allocation3 + $0x1], 1 }

</bundles_post_ra>
